<compile_context>
chip_gen: v6e
topology: v6e:2x2x1
jax: 0.10.0
libtpu: 0.0.40
codegen_flags: <defaults>
</compile_context>

<pallas_src>
import functools

import jax
import jax.numpy as jnp
import numpy as np
from jax import lax
from jax.experimental import pallas as pl
from jax.experimental.pallas import tpu as pltpu


def _ae_kernel(x_ref, w1_ref, b1_ref, w2_ref, b2_ref, w3_ref, b3_ref,
               w4_ref, b4_ref, recon_ref, psum_ref, *, tb, b_total):
    i = pl.program_id(0)
    x = x_ref[...]                       # (TB, F) float32 tile
    cdt = w1_ref.dtype                   # compute dtype for MXU (bf16 or f32)

    # encode: Linear -> ReLU -> (Dropout=id) -> Linear -> ReLU -> (Dropout=id)
    h1 = jnp.dot(x.astype(cdt), w1_ref[...],
                 preferred_element_type=jnp.float32) + b1_ref[...]
    h1 = jnp.maximum(h1, 0.0)
    z = jnp.dot(h1.astype(cdt), w2_ref[...],
                preferred_element_type=jnp.float32) + b2_ref[...]
    z = jnp.maximum(z, 0.0)

    # decode: Linear -> ReLU -> (Dropout=id) -> Linear
    h3 = jnp.dot(z.astype(cdt), w3_ref[...],
                 preferred_element_type=jnp.float32) + b3_ref[...]
    h3 = jnp.maximum(h3, 0.0)
    recon = jnp.dot(h3.astype(cdt), w4_ref[...],
                    preferred_element_type=jnp.float32) + b4_ref[...]

    recon_ref[...] = recon

    # Per-tile partial sum of squared error; padded batch rows are masked out.
    row_ids = i * tb + lax.broadcasted_iota(jnp.int32, recon.shape, 0)
    diff = jnp.where(row_ids < b_total, recon - x, 0.0)
    partial = jnp.sum(diff * diff)
    # Broadcast the scalar into an (1,8,128) block; wrapper reads [:, 0, 0].
    psum_ref[...] = jnp.full((1, 8, 128), partial, dtype=jnp.float32)


def ae_forward(x, params, *, block_batch=128):
    w1, b1, w2, b2, w3, b3, w4, b4 = params
    B, F = x.shape
    H = w1.shape[1]
    L = w2.shape[1]

    tb = block_batch
    num_tiles = pl.cdiv(B, tb)
    b_pad = num_tiles * tb
    if b_pad != B:
        x = jnp.pad(x, ((0, b_pad - B), (0, 0)))

    kernel = functools.partial(_ae_kernel, tb=tb, b_total=B)

    const = lambda i: (0, 0)  # weights/biases: same block every tile (VMEM-resident)
    in_specs = [
        pl.BlockSpec((tb, F), lambda i: (i, 0)),   # x tile
        pl.BlockSpec((F, H), const),               # w1
        pl.BlockSpec((1, H), const),               # b1
        pl.BlockSpec((H, L), const),               # w2
        pl.BlockSpec((1, L), const),               # b2
        pl.BlockSpec((L, H), const),               # w3
        pl.BlockSpec((1, H), const),               # b3
        pl.BlockSpec((H, F), const),               # w4
        pl.BlockSpec((1, F), const),               # b4
    ]
    out_specs = (
        pl.BlockSpec((tb, F), lambda i: (i, 0)),         # recon tile
        pl.BlockSpec((1, 8, 128), lambda i: (i, 0, 0)),  # per-tile loss partial
    )
    out_shape = (
        jax.ShapeDtypeStruct((b_pad, F), jnp.float32),
        jax.ShapeDtypeStruct((num_tiles, 8, 128), jnp.float32),
    )

    nbytes = lambda a: a.size * a.dtype.itemsize
    weight_bytes = sum(nbytes(a) for a in (w1, b1, w2, b2, w3, b3, w4, b4))
    cost = pl.CostEstimate(
        flops=2 * b_pad * (F * H + H * L + L * H + H * F),
        transcendentals=0,
        bytes_accessed=nbytes(x) + weight_bytes + b_pad * F * 4,
    )

    recon, psum = pl.pallas_call(
        kernel,
        out_shape=out_shape,
        grid=(num_tiles,),
        in_specs=in_specs,
        out_specs=out_specs,
        compiler_params=pltpu.CompilerParams(
            dimension_semantics=("parallel",),   # megacore sharding on v7x
        ),
        cost_estimate=cost,
    )(x, w1, b1, w2, b2, w3, b3, w4, b4)

    loss = jnp.sum(psum[:, 0, 0]) / (B * F)
    return loss, recon[:B]


def xavier_normal(key, fan_in, fan_out, dtype):
    std = float(np.sqrt(2.0 / (fan_in + fan_out)))
    w = jax.random.normal(key, (fan_in, fan_out), dtype=jnp.float32) * std
    return w.astype(dtype)


def make_params(key, num_features, hidden_nodes, latent=1024,
                weight_dtype=jnp.bfloat16):
    ks = jax.random.split(key, 4)
    w1 = xavier_normal(ks[0], num_features, hidden_nodes, weight_dtype)
    b1 = jnp.zeros((1, hidden_nodes), jnp.float32)
    w2 = xavier_normal(ks[1], hidden_nodes, latent, weight_dtype)
    b2 = jnp.zeros((1, latent), jnp.float32)
    w3 = xavier_normal(ks[2], latent, hidden_nodes, weight_dtype)
    b3 = jnp.zeros((1, hidden_nodes), jnp.float32)
    w4 = xavier_normal(ks[3], hidden_nodes, num_features, weight_dtype)
    b4 = jnp.zeros((1, num_features), jnp.float32)
    return (w1, b1, w2, b2, w3, b3, w4, b4)


def ae_forward_ref(x, params):
    """Pure-JAX reference doing the identical mixed-precision math."""
    w1, b1, w2, b2, w3, b3, w4, b4 = params
    cdt = w1.dtype
    h1 = jnp.maximum(
        jnp.dot(x.astype(cdt), w1, preferred_element_type=jnp.float32) + b1, 0.0)
    z = jnp.maximum(
        jnp.dot(h1.astype(cdt), w2, preferred_element_type=jnp.float32) + b2, 0.0)
    h3 = jnp.maximum(
        jnp.dot(z.astype(cdt), w3, preferred_element_type=jnp.float32) + b3, 0.0)
    recon = jnp.dot(h3.astype(cdt), w4, preferred_element_type=jnp.float32) + b4
    return jnp.mean((recon - x) ** 2), recon


if __name__ == "__main__":
    B = 256              # batch (2 grid tiles of TB=128)
    NUM_FEATURES = 256   # num_features
    HIDDEN = 128         # config.hidden_nodes
    LATENT = 1024        # hard-coded in the module
    TB = 128             # batch tile (MXU row tile)

    key = jax.random.PRNGKey(0)
    kx, kp = jax.random.split(key)
    x = jax.random.normal(kx, (B, NUM_FEATURES), dtype=jnp.float32)
    params = make_params(kp, NUM_FEATURES, HIDDEN, LATENT,
                         weight_dtype=jnp.bfloat16)

    fwd = jax.jit(functools.partial(ae_forward, block_batch=TB))
    loss, recon = fwd(x, params)
    jax.block_until_ready((loss, recon))

    loss_ref, recon_ref = ae_forward_ref(x, params)
    np.testing.assert_allclose(np.asarray(loss), np.asarray(loss_ref),
                               rtol=2e-2, atol=2e-2)
    np.testing.assert_allclose(np.asarray(recon), np.asarray(recon_ref),
                               rtol=2e-2, atol=2e-2)

    print("KERNEL_OK")
</pallas_src>

<mosaic_0001>
module attributes {stable_mosaic.version = 11 : i64} {
  func.func @_ae_kernel(%arg0: i32, %arg1: memref<128x256xf32, #tpu.memory_space<vmem>>, %arg2: memref<256x128xbf16, #tpu.memory_space<vmem>>, %arg3: memref<1x128xf32, #tpu.memory_space<vmem>>, %arg4: memref<128x1024xbf16, #tpu.memory_space<vmem>>, %arg5: memref<1x1024xf32, #tpu.memory_space<vmem>>, %arg6: memref<1024x128xbf16, #tpu.memory_space<vmem>>, %arg7: memref<1x128xf32, #tpu.memory_space<vmem>>, %arg8: memref<128x256xbf16, #tpu.memory_space<vmem>>, %arg9: memref<1x256xf32, #tpu.memory_space<vmem>>, %arg10: memref<128x256xf32, #tpu.memory_space<vmem>>, %arg11: memref<1x8x128xf32, #tpu.memory_space<vmem>>) attributes {dimension_semantics = [#tpu.dimension_semantics<parallel>], iteration_bounds = array<i64: 2>, scalar_prefetch = 0 : i64, scratch_operands = 0 : i64, tpu.core_type = #tpu.core_type<tc>, window_params = [{transform_indices = @transform_0, window_bounds = array<i64: 128, 256>}, {pipeline_mode = #tpu.pipeline_mode<synchronous>, transform_indices = @transform_1, window_bounds = array<i64: 256, 128>}, {pipeline_mode = #tpu.pipeline_mode<synchronous>, transform_indices = @transform_2, window_bounds = array<i64: 1, 128>}, {pipeline_mode = #tpu.pipeline_mode<synchronous>, transform_indices = @transform_3, window_bounds = array<i64: 128, 1024>}, {pipeline_mode = #tpu.pipeline_mode<synchronous>, transform_indices = @transform_4, window_bounds = array<i64: 1, 1024>}, {pipeline_mode = #tpu.pipeline_mode<synchronous>, transform_indices = @transform_5, window_bounds = array<i64: 1024, 128>}, {pipeline_mode = #tpu.pipeline_mode<synchronous>, transform_indices = @transform_6, window_bounds = array<i64: 1, 128>}, {pipeline_mode = #tpu.pipeline_mode<synchronous>, transform_indices = @transform_7, window_bounds = array<i64: 128, 256>}, {pipeline_mode = #tpu.pipeline_mode<synchronous>, transform_indices = @transform_8, window_bounds = array<i64: 1, 256>}, {transform_indices = @transform_9, window_bounds = array<i64: 128, 256>}, {transform_indices = @transform_10, window_bounds = array<i64: 1, 8, 128>}]} {
    %c0 = arith.constant 0 : index
    %c0_0 = arith.constant 0 : index
    %0 = vector.load %arg1[%c0, %c0_0] : memref<128x256xf32, #tpu.memory_space<vmem>>, vector<128x256xf32>
    %1 = arith.truncf %0 : vector<128x256xf32> to vector<128x256xbf16>
    %c0_1 = arith.constant 0 : index
    %c0_2 = arith.constant 0 : index
    %2 = vector.load %arg2[%c0_1, %c0_2] : memref<256x128xbf16, #tpu.memory_space<vmem>>, vector<256x128xbf16>
    %cst = arith.constant dense<0.000000e+00> : vector<128x128xf32>
    %3 = tpu.matmul %1, %2, %cst {dimension_numbers = #tpu.dot_dimension_numbers<[1], [0], [0], [1], [0, 0, 1, 1], [], []>} : vector<128x256xbf16>, vector<256x128xbf16>, vector<128x128xf32> -> vector<128x128xf32>
    %c0_3 = arith.constant 0 : index
    %c0_4 = arith.constant 0 : index
    %4 = vector.load %arg3[%c0_3, %c0_4] : memref<1x128xf32, #tpu.memory_space<vmem>>, vector<1x128xf32>
    %5 = vector.broadcast %4 : vector<1x128xf32> to vector<128x128xf32>
    %6 = arith.addf %3, %5 : vector<128x128xf32>
    %cst_5 = arith.constant 0.000000e+00 : f32
    %7 = vector.broadcast %cst_5 : f32 to vector<128x128xf32>
    %8 = arith.maximumf %6, %7 : vector<128x128xf32>
    %9 = arith.truncf %8 : vector<128x128xf32> to vector<128x128xbf16>
    %c0_6 = arith.constant 0 : index
    %c0_7 = arith.constant 0 : index
    %10 = vector.load %arg4[%c0_6, %c0_7] : memref<128x1024xbf16, #tpu.memory_space<vmem>>, vector<128x1024xbf16>
    %cst_8 = arith.constant dense<0.000000e+00> : vector<128x1024xf32>
    %11 = tpu.matmul %9, %10, %cst_8 {dimension_numbers = #tpu.dot_dimension_numbers<[1], [0], [0], [1], [0, 0, 1, 1], [], []>} : vector<128x128xbf16>, vector<128x1024xbf16>, vector<128x1024xf32> -> vector<128x1024xf32>
    %c0_9 = arith.constant 0 : index
    %c0_10 = arith.constant 0 : index
    %12 = vector.load %arg5[%c0_9, %c0_10] : memref<1x1024xf32, #tpu.memory_space<vmem>>, vector<1x1024xf32>
    %13 = vector.broadcast %12 : vector<1x1024xf32> to vector<128x1024xf32>
    %14 = arith.addf %11, %13 : vector<128x1024xf32>
    %cst_11 = arith.constant 0.000000e+00 : f32
    %15 = vector.broadcast %cst_11 : f32 to vector<128x1024xf32>
    %16 = arith.maximumf %14, %15 : vector<128x1024xf32>
    %17 = arith.truncf %16 : vector<128x1024xf32> to vector<128x1024xbf16>
    %c0_12 = arith.constant 0 : index
    %c0_13 = arith.constant 0 : index
    %18 = vector.load %arg6[%c0_12, %c0_13] : memref<1024x128xbf16, #tpu.memory_space<vmem>>, vector<1024x128xbf16>
    %cst_14 = arith.constant dense<0.000000e+00> : vector<128x128xf32>
    %19 = tpu.matmul %17, %18, %cst_14 {dimension_numbers = #tpu.dot_dimension_numbers<[1], [0], [0], [1], [0, 0, 1, 1], [], []>} : vector<128x1024xbf16>, vector<1024x128xbf16>, vector<128x128xf32> -> vector<128x128xf32>
    %c0_15 = arith.constant 0 : index
    %c0_16 = arith.constant 0 : index
    %20 = vector.load %arg7[%c0_15, %c0_16] : memref<1x128xf32, #tpu.memory_space<vmem>>, vector<1x128xf32>
    %21 = vector.broadcast %20 : vector<1x128xf32> to vector<128x128xf32>
    %22 = arith.addf %19, %21 : vector<128x128xf32>
    %cst_17 = arith.constant 0.000000e+00 : f32
    %23 = vector.broadcast %cst_17 : f32 to vector<128x128xf32>
    %24 = arith.maximumf %22, %23 : vector<128x128xf32>
    %25 = arith.truncf %24 : vector<128x128xf32> to vector<128x128xbf16>
    %c0_18 = arith.constant 0 : index
    %c0_19 = arith.constant 0 : index
    %26 = vector.load %arg8[%c0_18, %c0_19] : memref<128x256xbf16, #tpu.memory_space<vmem>>, vector<128x256xbf16>
    %cst_20 = arith.constant dense<0.000000e+00> : vector<128x256xf32>
    %27 = tpu.matmul %25, %26, %cst_20 {dimension_numbers = #tpu.dot_dimension_numbers<[1], [0], [0], [1], [0, 0, 1, 1], [], []>} : vector<128x128xbf16>, vector<128x256xbf16>, vector<128x256xf32> -> vector<128x256xf32>
    %c0_21 = arith.constant 0 : index
    %c0_22 = arith.constant 0 : index
    %28 = vector.load %arg9[%c0_21, %c0_22] : memref<1x256xf32, #tpu.memory_space<vmem>>, vector<1x256xf32>
    %29 = vector.broadcast %28 : vector<1x256xf32> to vector<128x256xf32>
    %30 = arith.addf %27, %29 : vector<128x256xf32>
    %c0_23 = arith.constant 0 : index
    %c0_24 = arith.constant 0 : index
    %31 = vector.load %arg10[%c0_23, %c0_24] : memref<128x256xf32, #tpu.memory_space<vmem>>, vector<128x256xf32>
    tpu.vector_store %arg10[%c0_23, %c0_24], %30 {strides = array<i32>} : memref<128x256xf32, #tpu.memory_space<vmem>>, vector<128x256xf32>,
    %c128_i32 = arith.constant 128 : i32
    %32 = arith.muli %arg0, %c128_i32 : i32
    %33 = tpu.iota {dimensions = array<i32: 0>} : vector<128x256xi32>
    %34 = vector.broadcast %32 : i32 to vector<128x256xi32>
    %35 = arith.addi %34, %33 : vector<128x256xi32>
    %c256_i32 = arith.constant 256 : i32
    %36 = vector.broadcast %c256_i32 : i32 to vector<128x256xi32>
    %37 = arith.cmpi slt, %35, %36 : vector<128x256xi32>
    %38 = arith.subf %30, %0 : vector<128x256xf32>
    %cst_25 = arith.constant 0.000000e+00 : f32
    %39 = vector.broadcast %cst_25 : f32 to vector<128x256xf32>
    %40 = arith.select %37, %38, %39 : vector<128x256xi1>, vector<128x256xf32>
    %41 = arith.mulf %40, %40 : vector<128x256xf32>
    %42 = vector.shape_cast %41 : vector<128x256xf32> to vector<1x128x256xf32>
    %cst_26 = arith.constant dense<0.000000e+00> : vector<1xf32>
    %43 = vector.multi_reduction <add>, %42, %cst_26 [1, 2] : vector<1x128x256xf32> to vector<1xf32>
    %44 = vector.shape_cast %43 : vector<1xf32> to vector<1x1x1xf32>
    %45 = vector.extract %44[0, 0, 0] : f32 from vector<1x1x1xf32>
    %46 = vector.broadcast %45 : f32 to vector<1x8x128xf32>
    %c0_27 = arith.constant 0 : index
    %c0_28 = arith.constant 0 : index
    %c0_29 = arith.constant 0 : index
    %47 = vector.load %arg11[%c0_27, %c0_28, %c0_29] : memref<1x8x128xf32, #tpu.memory_space<vmem>>, vector<1x8x128xf32>
    tpu.vector_store %arg11[%c0_27, %c0_28, %c0_29], %46 {strides = array<i32>} : memref<1x8x128xf32, #tpu.memory_space<vmem>>, vector<1x8x128xf32>,
    return
  }
  func.func @transform_0(%arg0: i32) -> (i32, i32) {
    %c0_i32 = arith.constant 0 : i32
    %c0_i32_0 = arith.constant 0 : i32
    return %arg0, %c0_i32 : i32, i32
  }
  func.func @transform_1(%arg0: i32) -> (i32, i32) {
    %c0_i32 = arith.constant 0 : i32
    %c0_i32_0 = arith.constant 0 : i32
    %c0_i32_1 = arith.constant 0 : i32
    return %c0_i32, %c0_i32_0 : i32, i32
  }
  func.func @transform_2(%arg0: i32) -> (i32, i32) {
    %c0_i32 = arith.constant 0 : i32
    %c0_i32_0 = arith.constant 0 : i32
    %c0_i32_1 = arith.constant 0 : i32
    return %c0_i32, %c0_i32_0 : i32, i32
  }
  func.func @transform_3(%arg0: i32) -> (i32, i32) {
    %c0_i32 = arith.constant 0 : i32
    %c0_i32_0 = arith.constant 0 : i32
    %c0_i32_1 = arith.constant 0 : i32
    return %c0_i32, %c0_i32_0 : i32, i32
  }
  func.func @transform_4(%arg0: i32) -> (i32, i32) {
    %c0_i32 = arith.constant 0 : i32
    %c0_i32_0 = arith.constant 0 : i32
    %c0_i32_1 = arith.constant 0 : i32
    return %c0_i32, %c0_i32_0 : i32, i32
  }
  func.func @transform_5(%arg0: i32) -> (i32, i32) {
    %c0_i32 = arith.constant 0 : i32
    %c0_i32_0 = arith.constant 0 : i32
    %c0_i32_1 = arith.constant 0 : i32
    return %c0_i32, %c0_i32_0 : i32, i32
  }
  func.func @transform_6(%arg0: i32) -> (i32, i32) {
    %c0_i32 = arith.constant 0 : i32
    %c0_i32_0 = arith.constant 0 : i32
    %c0_i32_1 = arith.constant 0 : i32
    return %c0_i32, %c0_i32_0 : i32, i32
  }
  func.func @transform_7(%arg0: i32) -> (i32, i32) {
    %c0_i32 = arith.constant 0 : i32
    %c0_i32_0 = arith.constant 0 : i32
    %c0_i32_1 = arith.constant 0 : i32
    return %c0_i32, %c0_i32_0 : i32, i32
  }
  func.func @transform_8(%arg0: i32) -> (i32, i32) {
    %c0_i32 = arith.constant 0 : i32
    %c0_i32_0 = arith.constant 0 : i32
    %c0_i32_1 = arith.constant 0 : i32
    return %c0_i32, %c0_i32_0 : i32, i32
  }
  func.func @transform_9(%arg0: i32) -> (i32, i32) {
    %c0_i32 = arith.constant 0 : i32
    %c0_i32_0 = arith.constant 0 : i32
    return %arg0, %c0_i32 : i32, i32
  }
  func.func @transform_10(%arg0: i32) -> (i32, i32, i32) {
    %c0_i32 = arith.constant 0 : i32
    %c0_i32_0 = arith.constant 0 : i32
    %c0_i32_1 = arith.constant 0 : i32
    return %arg0, %c0_i32, %c0_i32_0 : i32, i32, i32
  }
}

</mosaic_0001>

<bundles_post_ra>
// kernel: ae_forward.1
= control target key start
LH: loop header
LB: loop body
LE: loop exit
PB: predicated region body
PF: predicated region fallthrough
CT: control target
= control target key end

     0   :  { %s5313_s0 = inlined_call_operand.hbm [shape: f32[256,256], index: 0, kind: input, shape index: {}]   ;;  %s5314_s1 = inlined_call_operand.hbm [shape: bf16[256,128], index: 1, kind: input, shape index: {}]   ;;  %s5315_s2 = inlined_call_operand.vmem [shape: f32[1,128], index: 2, kind: input, shape index: {}]   ;;  %s5316_s3 = inlined_call_operand.hbm [shape: bf16[128,1024], index: 3, kind: input, shape index: {}]   ;;  %s5317_s4 = inlined_call_operand.hbm [shape: f32[1,1024], index: 4, kind: input, shape index: {}]   ;;  %s5318_s5 = inlined_call_operand.hbm [shape: bf16[1024,128], index: 5, kind: input, shape index: {}]   ;;  %s5319_s6 = inlined_call_operand.vmem [shape: f32[1,128], index: 6, kind: input, shape index: {}]   ;;  %s5320_s7 = inlined_call_operand.hbm [shape: bf16[128,256], index: 7, kind: input, shape index: {}]   ;;  %s5321_s8 = inlined_call_operand.vmem [shape: f32[1,256], index: 8, kind: input, shape index: {}]   ;;  %s5322_s9 = inlined_call_operand.hbm [shape: f32[256,256], index: 9, kind: output, shape index: {0}]   ;;  %s5323_s10 = inlined_call_operand.vmem [shape: f32[2,8,128], index: 10, kind: output, shape index: {1}]  }
   0x1   :  { %5330 = sst [smem:[#allocation19_spill]] %s5314_s1 }
   0x2   :  { %5331 = sst [smem:[#allocation20_spill]] %s5316_s3 }
   0x3   :  { %5332 = sst [smem:[#allocation21_spill]] %s5317_s4 }
   0x4   :  { %5333 = sst [smem:[#allocation22_spill]] %s5318_s5 }
   0x5   :  { %16 = vsyncpa [#allocation3], 0 }
   0x6   :  { %18 = vsyncpa [#allocation3 + $0x1], 0 }
   0x7   :  { %19 = vsyncpa [#allocation6], 0 }
   0x8   :  { %20 = vsyncpa [#allocation9], 0 }
   0x9   :  { %21 = vsyncpa [#allocation12], 0 }
   0xa   :  { %22 = vsyncpa [#allocation4], 0 }
   0xb   :  { %24 = vsyncpa [#allocation4 + $0x1], 0  ;;  %s4447_s13 = smov 0   ;;  %s4449_s14 = smov 0  }
   0xc   :  { %s4451_s15 = smov 0   ;;  %s4453_s16 = smov 0  }
   0xd LB: > { %s4374_s17 = smov [#allocation5]   ;;  %s4468_s19 = sadd.s32 4294967295, %s4372_s16   ;;  %s4372_s16 = sphi %s4453_s16, %s5361_s16   ;;  %s4368_s15 = sphi %s4451_s15, %s5360_s15   ;;  %s4364_s14 = sphi %s4449_s14, %s5359_s14   ;;  %s4360_s13 = sphi %s4447_s13, %s5358_s13  }
   0xe   : > { %s293_s18 = sshll.u32 %s4374_s17, 4  ;;  %p3379_p0 = scmp.ge.s32.totalorder %s4372_s16, 1  ;;  %s294_s18 = int_to_ptr.vmem [resolvable:$true] %s293_s18 }
   0xf   : > { %p5325_p1 = scmp.eq.s32.totalorder %s4468_s19, 0  ;;  %p281_p2 = scmp.lt.s32.totalorder %s4372_s16, 3 }
  0x10   : > { %s4375_s21 = smov [#allocation8]   ;;  %s4376_s24 = smov [#allocation7]  }
  0x11   : > { %p4473_p3 = pnand %p3379_p0, %p281_p2  ;;  %s323_s22 = sshll.u32 %s4375_s21, 4  ;;  %s324_s22 = int_to_ptr.vmem [resolvable:$true] %s323_s22 }
  0x12   : > { %s309_s25 = sshll.u32 %s4376_s24, 4  ;;  %s4149_s27 = scalar_lea.vmem %s294_s18, 2048  ;;  %s4486_s25 = int_to_ptr.vmem [resolvable:$true] %s309_s25 }
  0x13   : > { %s5334_s20 = scalar_select %p4473_p3, 1, 0 }
  0x14   : > { %p3918_p5 = pneg %p4473_p3  ;;  %p4150_p8 = scmp.ne.s32.totalorder %s294_s18, %s4149_s27 }
  0x15   : > { %p4157_p11 = scmp.lt.s32.totalorder %s294_s18, %s294_s18  ;;  %p4158_p12 = scmp.lt.s32.totalorder %s4149_s27, %s4149_s27 }
  0x16   : > { %p4482_p6 = pnand %p3918_p5, %p5325_p1 }
  0x17   : > { %p4159_p13 = por %p4158_p12, %p4157_p11 }
  0x18   : > { %p4490_p7 = pneg %p4482_p6 }
  0x1a   : > { %p4152_p9 = pnand %p4150_p8, %p4490_p7 }
  0x1c   : > { %p4153_p10 = pneg %p4152_p9 }
  0x1e   : > { %p4160_p0 = pnand %p4159_p13, %p4153_p10 }
  0x20   : > { %4163 = shalt.err (!%p4160_p0)
}
  0x21   : > { %s5324_s28 = smov 64   ;;  %s4378_s29 = smov 4  }
  0x22   : > { %s5337_s1 = sld [smem:[#allocation19_spill]]  ;;  %s4175_s12 = scalar_lea.vmem %s324_s22, 128 }
  0x23   : > { %p4176_p2 = scmp.ne.s32.totalorder %s324_s22, %s4175_s12  ;;  %p4183_p9 = scmp.lt.s32.totalorder %s324_s22, %s324_s22 }
  0x24   : > { %p4184_p10 = scmp.lt.s32.totalorder %s4175_s12, %s4175_s12 }
  0x25   : > { %p4178_p5 = pnand %p4176_p2, %p4490_p7 }
  0x26   : > { %p4185_p11 = por %p4184_p10, %p4183_p9 }
  0x27   : > { %p4179_p8 = pneg %p4178_p5 }
  0x28   : > { %3921 = dma.hbm_to_vmem [thread:$0]  (!%p4482_p6), %s5337_s1, 2048, %s294_s18, [#allocation6], %s5324_s28, %s5324_s28, %s4378_s29  }
  0x29   : > { %p4186_p12 = pnand %p4185_p11, %p4179_p8 }
  0x2b   : > { %4189 = shalt.err (!%p4186_p12)
}
  0x2c   : > { %s5338_s4 = sld [smem:[#allocation21_spill]]  ;;  %s4201_s18 = scalar_lea.vmem %s4486_s25, 8192 }
  0x2d   : > { %p4202_p13 = scmp.ne.s32.totalorder %s4486_s25, %s4201_s18  ;;  %p4209_p5 = scmp.lt.s32.totalorder %s4486_s25, %s4486_s25 }
  0x2e   : > { %p4210_p9 = scmp.lt.s32.totalorder %s4201_s18, %s4201_s18 }
  0x2f   : > { %p4204_p0 = pnand %p4202_p13, %p4490_p7 }
  0x30   : > { %p4211_p8 = por %p4210_p9, %p4209_p5 }
  0x31   : > { %p4205_p2 = pneg %p4204_p0 }
  0x32   : > { %3927 = dma.hbm_to_vmem [thread:$0]  (!%p4482_p6), %s5338_s4, 128, %s324_s22, [#allocation9]  }
  0x33   : > { %p4212_p10 = pnand %p4211_p8, %p4205_p2 }
  0x35   : > { %4215 = shalt.err (!%p4212_p10)
}
  0x36   : > { %s4379_s24 = smov 512   ;;  %s4380_s27 = smov 32  }
  0x37   : > { %s5339_s3 = sld [smem:[#allocation20_spill]]  ;;  %s4381_s22 = smov [#allocation10]  }
  0x38   : > { %s333_s12 = sshll.u32 %s4381_s22, 4  ;;  %s4382_s17 = smov [#allocation11]   ;;  %s334_s12 = int_to_ptr.vmem [resolvable:$true] %s333_s12 }
  0x39   : > { %s349_s21 = sshll.u32 %s4382_s17, 4  ;;  %s4227_s28 = scalar_lea.vmem %s334_s12, 8192  ;;  %s350_s21 = int_to_ptr.vmem [resolvable:$true] %s349_s21 }
  0x3a   : > { %p4228_p11 = scmp.ne.s32.totalorder %s334_s12, %s4227_s28  ;;  %p4235_p0 = scmp.lt.s32.totalorder %s334_s12, %s334_s12 }
  0x3b   : > { %p4236_p2 = scmp.lt.s32.totalorder %s4227_s28, %s4227_s28 }
  0x3c   : > { %p4230_p12 = pnand %p4228_p11, %p4490_p7 }
  0x3d   : > { %3924 = dma.hbm_to_vmem [thread:$0]  (!%p4482_p6), %s5339_s3, 8192, %s4486_s25, [#allocation6], %s4379_s24, %s4379_s24, %s4380_s27  }
  0x3e   : > { %p4231_p13 = pneg %p4230_p12  ;;  %p4237_p5 = por %p4236_p2, %p4235_p0 }
  0x40   : > { %p4238_p9 = pnand %p4237_p5, %p4231_p13 }
  0x42   : > { %4241 = shalt.err (!%p4238_p9)
}
  0x43   : > { %s5340_s18 = smov 64   ;;  %s5341_s5 = sld [smem:[#allocation22_spill]] }
  0x44   : > { %s4253_s27 = scalar_lea.vmem %s350_s21, 2048  ;;  %p4261_p12 = scmp.lt.s32.totalorder %s350_s21, %s350_s21 }
  0x45   : > { %p4254_p8 = scmp.ne.s32.totalorder %s350_s21, %s4253_s27  ;;  %p4262_p0 = scmp.lt.s32.totalorder %s4253_s27, %s4253_s27 }
  0x47   : > { %p4256_p10 = pnand %p4254_p8, %p4490_p7  ;;  %p4263_p13 = por %p4262_p0, %p4261_p12 }
  0x49   : > { %3930 = dma.hbm_to_vmem [thread:$0]  (!%p4482_p6), %s5341_s5, 8192, %s334_s12, [#allocation9], %s5340_s18, %s5340_s18, %s4378_s29  }
  0x4a   : > { %p4257_p11 = pneg %p4256_p10 }
  0x4c   : > { %p4264_p2 = pnand %p4263_p13, %p4257_p11 }
  0x4e   : > { %4267 = shalt.err (!%p4264_p2)
}
  0x4f   : > { %s4383_s28 = smov 128   ;;  %s4384_s26 = smov 8  }
  0x50   : > { %3933 = dma.hbm_to_vmem [thread:$0]  (!%p4482_p6), %s5320_s7, 2048, %s350_s21, [#allocation12], %s4383_s28, %s4383_s28, %s4384_s26  }
  0x51   : > { %s3378_s11 = sadd.s32 4294967294, %s4372_s16   ;;  %s4542_s22 = sadd.s32 1, %s4372_s16  }
  0x52   : > { %s37_s12 = sadd.s32 1, %s4368_s15  ;;  %s34_s17 = ssub.s32 %s4372_s16, %s4542_s22 }
  0x53   : > { %p44_p7 = scmp.ne.s32.totalorder %s4368_s15, %s4364_s14  ;;  %p35_p5 = scmp.eq.s32.totalorder %s34_s17, 0 }
  0x54   : > { %p45_p9 = scmp.eq.s32.totalorder %s4372_s16, 0  ;;  %p50_p8 = scmp.ne.s32.totalorder %s4364_s14, %s4360_s13 }
  0x55   : > { %p242_p10 = scmp.eq.s32.totalorder %s4468_s19, 1  ;;  %p248_p0 = scmp.eq.s32.totalorder %s3378_s11, 1 }
  0x56   : > { %s4554_s18 = scalar_select %p35_p5, %s4368_s15, %s37_s12  }
  0x57   : > { %p46_p11 = por %p45_p9, %p44_p7  ;;  %p4558_p12 = por %p5325_p1, %p50_p8 }
  0x58   : > { %p4562_p6 = por %p242_p10, %p44_p7  ;;  %p3947_p13 = scmp.lt.s32.totalorder %s4372_s16, 2 }
  0x59   : > { %s5342_s23 = scalar_select %p4558_p12, 1, 0 }
  0x5a   : > { %s5343_s21 = scalar_select %p4562_p6, 1, 0 }
  0x5b   : > { %s366_s25 = sand.u32 1, %s4368_s15   ;;  %p4568_p2 = por %p248_p0, %p50_p8 }
  0x5c   : > { %s3386_s27 = sshll.u32 %s366_s25, 8  ;;  %s3569_s28 = sshll.u32 %s4372_s16, 12 }
  0x5d   : > { %s5344_s24 = scalar_select %p4568_p2, 1, 0 }
  0x5e   : > { %s4576_s30 = scalar_lea.hbm %s5313_s0, %s3569_s28  ;;  %s370_s12 = scalar_lea.vmem [#allocation2], %s3386_s27 }
  0x5f   : > { %s378_s17 = sshll.u32 %s370_s12, 4  ;;  %p4578_p7 = pnand %p3947_p13, %p46_p11  ;;  %s4582_s17 = int_to_ptr.vmem [resolvable:$true] %s378_s17 }
  0x60   : > { %s4584_s1 = scalar_lea.sflag [#allocation3], %s366_s25  ;;  %s4268_s3 = scalar_lea.hbm %s4576_s30, 4096 }
  0x61   : > { %p4269_p5 = scmp.ne.s32.totalorder %s4576_s30, %s4268_s3  ;;  %p4270_p9 = pneg %p4578_p7 }
  0x62   : > { %s4273_s27 = scalar_lea.hbm %s5313_s0, 8192  ;;  %p4274_p11 = scmp.lt.s32.totalorder %s4576_s30, %s5313_s0 }
  0x63   : > { %p4271_p8 = pnand %p4270_p9, %p4269_p5  ;;  %p4275_p0 = scmp.lt.s32.totalorder %s4273_s27, %s4268_s3 }
  0x65   : > { %p4272_p10 = pneg %p4271_p8  ;;  %p4276_p13 = por %p4275_p0, %p4274_p11 }
  0x67   : > { %p4277_p4 = pnand %p4276_p13, %p4272_p10 }
  0x69   : > { %4280 = shalt.err (!%p4277_p4)
}
  0x6a   : > { %s4281_s25 = scalar_lea.vmem %s4582_s17, 4096  ;;  %s4385_s4 = smov [#allocation2]  }
  0x6b   : > { %p4282_p1 = scmp.ne.s32.totalorder %s4582_s17, %s4281_s25  ;;  %s4286_s5 = sshll.u32 %s4385_s4, 4  ;;  %s4287_s5 = int_to_ptr.vmem [resolvable:$false] %s4286_s5 }
  0x6c   : > { %s4288_s28 = scalar_lea.vmem %s4287_s5, 8192  ;;  %p4289_p8 = scmp.lt.s32.totalorder %s4582_s17, %s4287_s5 }
  0x6d   : > { %p4284_p2 = pnand %p4282_p1, %p4270_p9  ;;  %p4290_p6 = scmp.lt.s32.totalorder %s4288_s28, %s4281_s25 }
  0x6f   : > { %p4285_p5 = pneg %p4284_p2  ;;  %p4291_p12 = por %p4290_p6, %p4289_p8 }
  0x71   : > { %p4292_p3 = pnand %p4291_p12, %p4285_p5 }
  0x73   : > { %4295 = shalt.err (!%p4292_p3)
}
  0x74   : > { %s4386_s3 = smov 256   ;;  %s4387_s26 = smov 16  }
  0x75   : > { %3937 = dma.hbm_to_vmem [thread:$0]  (!%p4578_p7), %s4576_s30, 4096, %s4582_s17, %s4584_s1, %s4386_s3, %s4386_s3, %s4387_s26  }
  0x76   : > { %p5346_p1 = scmp.ne.s32.totalorder %s5334_s20, 0 }
  0x77   : > { %s4608_s4 = sand.u32 (!%p5346_p1), 1, %s4364_s14   ;;  %p5347_p3 = scmp.ne.s32.totalorder (!%p5346_p1), %s5342_s23, 0 }
  0x78   : > { %390 = sbr.rel (%p5346_p1) target bundleno = 1321 (0x529), region = 56  ;;  %s3391_s5 = sshll.u32 (!%p5346_p1), %s4608_s4, 8 }
  0x79   : > { %s393_s27 = scalar_lea.sflag (!%p5346_p1), [#allocation3], %s4608_s4  ;;  %s4614_s29 = scalar_lea.vmem (!%p5346_p1), [#allocation2], %s3391_s5 }
  0x7d   : > { %4339 = dma.done.wait (%p5347_p3), %s393_s27, 4096  }
  0x7e   : > { %4341 = vsyncadd (%p5347_p3), %s393_s27, 4294963200  ;;  %p5348_p4 = scmp.eq.s32.totalorder %s4468_s19, 0 }
  0x80   : > { %4343 = dma.done.wait (%p5348_p4), [#allocation6], 10240   ;;  %p5349_p12 = pmov %p5348_p4 }
  0x81   : > { %p5350_p6 = pmov %p5348_p4 }
  0x82   : > { %4345 = vsyncadd (%p5349_p12), [#allocation6], 4294957056 }
  0x83   : > { %4347 = dma.done.wait (%p5350_p6), [#allocation9], 8320   ;;  %p5351_p2 = pmov %p5348_p4 }
  0x85   : > { %4349 = vsyncadd (%p5351_p2), [#allocation9], 4294958976  ;;  %p5352_p7 = pmov %p5351_p2 }
  0x86   : > { %p5353_p9 = pmov %p5351_p2 }
  0x87   : > { %4351 = dma.done.wait (%p5352_p7), [#allocation12], 2048  }
  0x88   : > { %4353 = vsyncadd (%p5353_p9), [#allocation12], 4294965248  ;;  %v4002_v0 = vld [vmem:[#allocation5 + $0x78] sm:$0xff]   ;;  %v4004_v2 = vld [vmem:[#allocation5 + $0x70] sm:$0xff]   ;;  %s3561_s17 = sshll.u32 %s4468_s19, 7  ;;  %s5104_s25 = scalar_lea.vmem [#allocation13], %s3391_s5 }
  0x89   : > { %v4003_v1 = vld [vmem:[#allocation5 + $0x38] sm:$0xff]   ;;  %3572 = vmatprep.subr.bf16.mxu0 %v4002_v0  ;;  %v4005_v3 = vld [vmem:[#allocation5 + $0x30] sm:$0xff]   ;;  %v4006_v4 = vld [vmem:[#allocation5 + $0x68] sm:$0xff]   ;;  %s3571_s28 = sshll.u32 %s4468_s19, 12  ;;  %s3230_s3 = sshll.u32 %s5104_s25, 4  ;;  %s5265_s3 = int_to_ptr.vmem [resolvable:$true] %s3230_s3 }
  0x8a   : > { %3573 = vmatpush3.bf16.msra.mxu0 %v4003_v1  ;;  %v4007_v5 = vld [vmem:[#allocation5 + $0x28] sm:$0xff]   ;;  %v4008_v6 = vld [vmem:[#allocation5 + $0x60] sm:$0xff]   ;;  %v4010_v8 = vld [vmem:[#allocation5 + $0x58] sm:$0xff]   ;;  %s5263_s27 = scalar_lea.hbm %s5322_s9, %s3571_s28  ;;  %s4296_s1 = scalar_lea.vmem %s5265_s3, 4096 }
  0x8b   : > { %3574 = vmatprep.subr.bf16.mxu0 %v4004_v2  ;;  %v4009_v7 = vld [vmem:[#allocation5 + $0x20] sm:$0xff]   ;;  %v4011_v9 = vld [vmem:[#allocation5 + $0x18] sm:$0xff]   ;;  %v4012_v10 = vld [vmem:[#allocation5 + $0x50] sm:$0xff]   ;;  %p4297_p10 = scmp.ne.s32.totalorder %s5265_s3, %s4296_s1  ;;  %p5355_p11 = scmp.ne.s32.totalorder %s5343_s21, 0 }
  0x8c   : > { %v465_v11 = vld [vmem:[%s4614_s29 + $0x8] sm:$0xff]  ;;  %v467_v12 = vld [vmem:[%s4614_s29 + $0x18] sm:$0xff]  ;;  %v4013_v14 = vld [vmem:[#allocation5 + $0x10] sm:$0xff]   ;;  %s4389_s20 = smov [#allocation13]  }
  0x8d   : > { %v497_v13 = vpack.c.bf16 %v467_v12, %v465_v11  ;;  %v4014_v15 = vld [vmem:[#allocation5 + $0x48] sm:$0xff]   ;;  %v4016_v17 = vld [vmem:[#allocation5 + $0x40] sm:$0xff]   ;;  %v466_v21 = vld [vmem:[%s4614_s29 + $0x10] sm:$0xff]  ;;  %p4298_p0 = pnand %p4297_p10, %p5355_p11  ;;  %s4300_s23 = sshll.u32 %s4389_s20, 4  ;;  %s4301_s23 = int_to_ptr.vmem [resolvable:$false] %s4300_s23 }
  0x8e   : > { %3575 = vmatpush3.bf16.msra.mxu0 %v4005_v3  ;;  %v4015_v16 = vld [vmem:[#allocation5 + $0x8] sm:$0xff]   ;;  %v4017_v18 = vld [vmem:[#allocation5] sm:$0xff]   ;;  %v471_v24 = vld [vmem:[%s4614_s29 + $0x38] sm:$0xff]  ;;  %s4302_s30 = scalar_lea.vmem %s4301_s23, 8192  ;;  %p4303_p5 = scmp.lt.s32.totalorder %s5265_s3, %s4301_s23 }
  0x8f   : > { %3576 = vmatprep.subr.bf16.mxu0 %v4006_v4  ;;  %679 = vmatprep.mubr.bf16.mxu0 %v497_v13  ;;  %v825_v19 = vld [vmem:[#allocation7 + $0x1c8] sm:$0xff]  ;;  %v464_v20 = vld [vmem:[%s4614_s29] sm:$0xff]  ;;  %v470_v43 = vld [vmem:[%s4614_s29 + $0x30] sm:$0xff]  ;;  %p4299_p13 = pneg %p4298_p0  ;;  %p4304_p8 = scmp.lt.s32.totalorder %s4302_s30, %s4296_s1 }
  0x90   : > { %v829_v22 = vld [vmem:[#allocation7 + $0x1e8] sm:$0xff]  ;;  %v824_v28 = vld [vmem:[#allocation7 + $0x1c0] sm:$0xff]  ;;  %v496_v30 = vpack.c.bf16 %v466_v21, %v464_v20  ;;  %v475_v49 = vld [vmem:[%s4614_s29 + $0x58] sm:$0xff] }
  0x91   : > { %v469_v23 = vld [vmem:[%s4614_s29 + $0x28] sm:$0xff]  ;;  %v3475_v25 = vcombine.high %v825_v19, %v829_v22  ;;  %v828_v29 = vld [vmem:[#allocation7 + $0x1e0] sm:$0xff]  ;;  %v3474_v35 = vcombine.low %v825_v19, %v829_v22  ;;  %v474_v2 = vld [vmem:[%s4614_s29 + $0x50] sm:$0xff]  ;;  %p4305_p1 = por %p4304_p8, %p4303_p5 }
  0x92   : > { %3577 = vmatpush3.bf16.msra.mxu0 %v4007_v5  ;;  %v817_v26 = vld [vmem:[#allocation7 + $0x188] sm:$0xff]  ;;  %v3473_v31 = vcombine.high %v824_v28, %v828_v29  ;;  %v3472_v32 = vcombine.low %v824_v28, %v828_v29  ;;  %v816_v33 = vld [vmem:[#allocation7 + $0x180] sm:$0xff]  ;;  %v499_v34 = vpack.c.bf16 %v471_v24, %v469_v23  ;;  %v479_v5 = vld [vmem:[%s4614_s29 + $0x78] sm:$0xff] }
  0x93   : > { %3578 = vmatprep.subr.bf16.mxu0 %v4008_v6  ;;  %v821_v27 = vld [vmem:[#allocation7 + $0x1a8] sm:$0xff]  ;;  %v820_v36 = vld [vmem:[#allocation7 + $0x1a0] sm:$0xff]  ;;  %v483_v19 = vld [vmem:[%s4614_s29 + $0x98] sm:$0xff]  ;;  %p4306_p3 = pnand %p4305_p1, %p4299_p13 }
  0x94   : > { %v808_v37 = vld [vmem:[#allocation7 + $0x140] sm:$0xff]  ;;  %v3467_v39 = vcombine.high %v817_v26, %v821_v27  ;;  %v809_v40 = vld [vmem:[#allocation7 + $0x148] sm:$0xff]  ;;  %1194 = vmatprep.subr.bf16.mxu1 %v3473_v31  ;;  %v3465_v41 = vcombine.high %v816_v33, %v820_v36  ;;  %v3464_v45 = vcombine.low %v816_v33, %v820_v36  ;;  %v3466_v51 = vcombine.low %v817_v26, %v821_v27  ;;  %v482_v24 = vld [vmem:[%s4614_s29 + $0x90] sm:$0xff] }
  0x95   : > { %v812_v38 = vld [vmem:[#allocation7 + $0x160] sm:$0xff]  ;;  %v813_v44 = vld [vmem:[#allocation7 + $0x168] sm:$0xff]  ;;  %1195 = vmatpush1.bf16.msra.mxu1 %v3472_v32  ;;  %v487_v26 = vld [vmem:[%s4614_s29 + $0xb8] sm:$0xff] }
  0x96   : > { %3579 = vmatpush3.bf16.msra.mxu0 %v4009_v7  ;;  %v468_v42 = vld [vmem:[%s4614_s29 + $0x20] sm:$0xff]  ;;  %v473_v48 = vld [vmem:[%s4614_s29 + $0x48] sm:$0xff]  ;;  %1196 = vmatprep.subr.bf16.mxu1 %v3465_v41  ;;  %v3457_v50 = vcombine.high %v808_v37, %v812_v38  ;;  %v3459_v54 = vcombine.high %v809_v40, %v813_v44  ;;  %v3456_v55 = vcombine.low %v808_v37, %v812_v38  ;;  %v491_v32 = vld [vmem:[%s4614_s29 + $0xd8] sm:$0xff] }
  0x97   : > { %3580 = vmatprep.subr.bf16.mxu0 %v4010_v8  ;;  %v800_v46 = vld [vmem:[#allocation7 + $0x100] sm:$0xff]  ;;  %v801_v52 = vld [vmem:[#allocation7 + $0x108] sm:$0xff]  ;;  %v498_v58 = vpack.c.bf16 %v470_v43, %v468_v42  ;;  %v501_v60 = vpack.c.bf16 %v475_v49, %v473_v48  ;;  %v3458_v61 = vcombine.low %v809_v40, %v813_v44  ;;  %v490_v36 = vld [vmem:[%s4614_s29 + $0xd0] sm:$0xff] }
  0x98   : > { %v804_v47 = vld [vmem:[#allocation7 + $0x120] sm:$0xff]  ;;  %v805_v53 = vld [vmem:[#allocation7 + $0x128] sm:$0xff]  ;;  %v495_v38 = vld [vmem:[%s4614_s29 + $0xf8] sm:$0xff] }
  0x99   : > { %1197 = vmatpush1.bf16.msra.mxu1 %v3464_v45  ;;  %v792_v56 = vld [vmem:[#allocation7 + $0xc0] sm:$0xff]  ;;  %v3449_v59 = vcombine.high %v800_v46, %v804_v47  ;;  %v793_v62 = vld [vmem:[#allocation7 + $0xc8] sm:$0xff]  ;;  %v3451_v0 = vcombine.high %v801_v52, %v805_v53  ;;  %v3448_v3 = vcombine.low %v800_v46, %v804_v47  ;;  %v3450_v7 = vcombine.low %v801_v52, %v805_v53  ;;  %v494_v42 = vld [vmem:[%s4614_s29 + $0xf0] sm:$0xff] }
  0x9a   : > { %3581 = vmatpush3.bf16.msra.mxu0 %v4011_v9  ;;  %v796_v57 = vld [vmem:[#allocation7 + $0xe0] sm:$0xff]  ;;  %1198 = vmatprep.subr.bf16.mxu1 %v3457_v50  ;;  %v797_v63 = vld [vmem:[#allocation7 + $0xe8] sm:$0xff] }
  0x9b   : > { %3582 = vmatprep.subr.bf16.mxu0 %v4012_v10  ;;  %v472_v1 = vld [vmem:[%s4614_s29 + $0x40] sm:$0xff]  ;;  %v477_v4 = vld [vmem:[%s4614_s29 + $0x68] sm:$0xff]  ;;  %v3441_v6 = vcombine.high %v792_v56, %v796_v57  ;;  %v3443_v10 = vcombine.high %v793_v62, %v797_v63  ;;  %v3440_v11 = vcombine.low %v792_v56, %v796_v57 }
  0x9c   : > { %v785_v8 = vld [vmem:[#allocation7 + $0x88] sm:$0xff]  ;;  %v500_v12 = vpack.c.bf16 %v474_v2, %v472_v1  ;;  %v503_v13 = vpack.c.bf16 %v479_v5, %v477_v4  ;;  %v480_v23 = vld [vmem:[%s4614_s29 + $0x80] sm:$0xff]  ;;  %v826_v1 = vld [vmem:[#allocation7 + $0x1d0] sm:$0xff] }
  0x9d   : > { %1199 = vmatpush1.bf16.msra.mxu1 %v3456_v55  ;;  %v789_v9 = vld [vmem:[#allocation7 + $0xa8] sm:$0xff]  ;;  %v504_v27 = vpack.c.bf16 %v482_v24, %v480_v23  ;;  %v484_v29 = vld [vmem:[%s4614_s29 + $0xa0] sm:$0xff]  ;;  %v830_v2 = vld [vmem:[#allocation7 + $0x1f0] sm:$0xff] }
  0x9e   : > { %3583 = vmatpush3.bf16.msra.mxu0 %v4013_v14  ;;  %1200 = vmatprep.subr.bf16.mxu1 %v3449_v59  ;;  %v3442_v14 = vcombine.low %v793_v62, %v797_v63  ;;  %v3434_v20 = vcombine.low %v785_v8, %v789_v9  ;;  %v489_v31 = vld [vmem:[%s4614_s29 + $0xc8] sm:$0xff]  ;;  %v492_v41 = vld [vmem:[%s4614_s29 + $0xe0] sm:$0xff]  ;;  %v3476_v4 = vcombine.low %v826_v1, %v830_v2  ;;  %v822_v24 = vld [vmem:[#allocation7 + $0x1b0] sm:$0xff] }
  0x9f   : > { %3584 = vmatprep.subr.bf16.mxu0 %v4014_v15  ;;  %v3435_v15 = vcombine.high %v785_v8, %v789_v9  ;;  %v493_v37 = vld [vmem:[%s4614_s29 + $0xe8] sm:$0xff]  ;;  %v510_v43 = vpack.c.bf16 %v494_v42, %v492_v41  ;;  %v784_v48 = vld [vmem:[#allocation7 + $0x80] sm:$0xff]  ;;  %v3477_v5 = vcombine.high %v826_v1, %v830_v2  ;;  %v799_v1 = vld [vmem:[#allocation7 + $0xf8] sm:$0xff] }
  0xa0   : > { %v511_v40 = vpack.c.bf16 %v495_v38, %v493_v37  ;;  %v777_v44 = vld [vmem:[#allocation7 + $0x48] sm:$0xff]  ;;  %v788_v49 = vld [vmem:[#allocation7 + $0xa0] sm:$0xff] }
  0xa1   : > { %1201 = vmatpush1.bf16.msra.mxu1 %v3448_v3  ;;  %v781_v45 = vld [vmem:[#allocation7 + $0x68] sm:$0xff]  ;;  %v3433_v50 = vcombine.high %v784_v48, %v788_v49  ;;  %v776_v52 = vld [vmem:[#allocation7 + $0x40] sm:$0xff]  ;;  %v827_v3 = vld [vmem:[#allocation7 + $0x1d8] sm:$0xff] }
  0xa2   : > { %3585 = vmatpush3.bf16.msra.mxu0 %v4015_v16  ;;  %1202 = vmatprep.subr.bf16.mxu1 %v3441_v6  ;;  %v476_v16 = vld [vmem:[%s4614_s29 + $0x60] sm:$0xff]  ;;  %v3426_v46 = vcombine.low %v777_v44, %v781_v45  ;;  %v3427_v47 = vcombine.high %v777_v44, %v781_v45  ;;  %v769_v56 = vld [vmem:[#allocation7 + $0x8] sm:$0xff]  ;;  %v831_v6 = vld [vmem:[#allocation7 + $0x1f8] sm:$0xff] }
  0xa3   : > { %3586 = vmatprep.subr.bf16.mxu0 %v4016_v17  ;;  %v478_v17 = vld [vmem:[%s4614_s29 + $0x70] sm:$0xff]  ;;  %v780_v53 = vld [vmem:[#allocation7 + $0x60] sm:$0xff]  ;;  %v773_v57 = vld [vmem:[#allocation7 + $0x28] sm:$0xff]  ;;  %v3479_v8 = vcombine.high %v827_v3, %v831_v6 }
  0xa4   : > { %v502_v21 = vpack.c.bf16 %v478_v17, %v476_v16  ;;  %v3424_v55 = vcombine.low %v776_v52, %v780_v53  ;;  %v3419_v59 = vcombine.high %v769_v56, %v773_v57  ;;  %v802_v45 = vld [vmem:[#allocation7 + $0x110] sm:$0xff] }
  0xa5   : > { %1203 = vmatpush1.bf16.msra.mxu1 %v3440_v11 }
  0xa6   : > { %3587 = vmatpush3.bf16.msra.mxu0 %v4017_v18  ;;  %v481_v18 = vld [vmem:[%s4614_s29 + $0x88] sm:$0xff]  ;;  %1204 = vmatprep.subr.bf16.mxu1 %v3433_v50  ;;  %v803_v50 = vld [vmem:[#allocation7 + $0x118] sm:$0xff] }
  0xa7   : > { %1307 = vmatprep.subr.bf16.mxu0 %v3475_v25  ;;  %v505_v22 = vpack.c.bf16 %v483_v19, %v481_v18  ;;  %v485_v25 = vld [vmem:[%s4614_s29 + $0xa8] sm:$0xff] }
  0xa8   : > { %v507_v28 = vpack.c.bf16 %v487_v26, %v485_v25  ;;  %v819_v25 = vld [vmem:[#allocation7 + $0x198] sm:$0xff] }
  0xa9   : > { %680 = vmatmul.mubr.bf16.vlgmr.msra.gmra.mxu0 %v496_v30  ;;  %v486_v30 = vld [vmem:[%s4614_s29 + $0xb0] sm:$0xff]  ;;  %v823_v26 = vld [vmem:[#allocation7 + $0x1b8] sm:$0xff] }
  0xaa   : > { %687 = vmatprep.mubr.bf16.mxu0 %v499_v34  ;;  %1308 = vmatpush1.bf16.msra.mxu0 %v3474_v35  ;;  %v506_v33 = vpack.c.bf16 %v486_v30, %v484_v29  ;;  %v509_v34 = vpack.c.bf16 %v491_v32, %v489_v31  ;;  %v488_v35 = vld [vmem:[%s4614_s29 + $0xc0] sm:$0xff]  ;;  %v810_v29 = vld [vmem:[#allocation7 + $0x150] sm:$0xff]  ;;  %v3471_v32 = vcombine.high %v819_v25, %v823_v26 }
  0xab   : > { %1309 = vmatprep.subr.bf16.mxu0 %v3467_v39  ;;  %v508_v39 = vpack.c.bf16 %v490_v36, %v488_v35  ;;  %v815_v35 = vld [vmem:[#allocation7 + $0x178] sm:$0xff] }
  0xae   : > { %1310 = vmatpush1.bf16.msra.mxu0 %v3466_v51  ;;  %v3432_v51 = vcombine.low %v784_v48, %v788_v49  ;;  %v806_v49 = vld [vmem:[#allocation7 + $0x130] sm:$0xff] }
  0xaf   : > { %1311 = vmatprep.subr.bf16.mxu0 %v3459_v54  ;;  %v3425_v54 = vcombine.high %v776_v52, %v780_v53 }
  0xb0   : > { %1205 = vmatpush1.bf16.msra.mxu1 %v3432_v51  ;;  %v807_v51 = vld [vmem:[#allocation7 + $0x138] sm:$0xff] }
  0xb1   : > { %688 = vmatmul.mubr.bf16.gmra.mxu0 %v498_v58  ;;  %1206 = vmatprep.subr.bf16.mxu1 %v3425_v54  ;;  %v768_v58 = vld [vmem:[#allocation7] sm:$0xff] }
  0xb2   : > { %695 = vmatprep.mubr.bf16.mxu0 %v501_v60  ;;  %1312 = vmatpush1.bf16.msra.mxu0 %v3458_v61  ;;  %v772_v60 = vld [vmem:[#allocation7 + $0x20] sm:$0xff]  ;;  %v3418_v61 = vcombine.low %v769_v56, %v773_v57  ;;  %v3453_v57 = vcombine.high %v802_v45, %v806_v49 }
  0xb3   : > { %1313 = vmatprep.subr.bf16.mxu0 %v3451_v0  ;;  %v3417_v62 = vcombine.high %v768_v58, %v772_v60  ;;  %v3416_v63 = vcombine.low %v768_v58, %v772_v60  ;;  %v4388_v0 = vmov 0   ;;  %v3455_v58 = vcombine.high %v803_v50, %v807_v51 }
  0xb4   : > { %1207 = vmatpush1.bf16.msra.mxu1 %v3424_v55  ;;  %1226 = vmatprep.mubr.bf16.mxu1 %v4388_v0 }
  0xb5   : > { %1208 = vmatprep.subr.bf16.mxu1 %v3417_v62  ;;  %v798_v62 = vld [vmem:[#allocation7 + $0xf0] sm:$0xff] }
  0xb6   : > { %1314 = vmatpush1.bf16.msra.mxu0 %v3450_v7  ;;  %v3478_v7 = vcombine.low %v827_v3, %v831_v6 }
  0xb7   : > { %1315 = vmatprep.subr.bf16.mxu0 %v3443_v10 }
  0xb8   : > { %1209 = vmatpush1.bf16.msra.mxu1 %v3416_v63  ;;  %v795_v63 = vld [vmem:[#allocation7 + $0xd8] sm:$0xff] }
  0xb9   : > { %696 = vmatmul.mubr.bf16.gmra.mxu0 %v500_v12  ;;  %1420 = vmatprep.subr.bf16.mxu1 %v3477_v5  ;;  %v4669_v12 = vld [vmem:[%s5315_s2] ss:$0 sm:$0xff]  ;;  %v3454_v5 = vcombine.low %v803_v50, %v807_v51 }
  0xba   : > { %703 = vmatprep.mubr.bf16.mxu0 %v503_v13  ;;  %1316 = vmatpush1.bf16.msra.mxu0 %v3442_v14 }
  0xbb   : > { %1317 = vmatprep.subr.bf16.mxu0 %v3435_v15 }
  0xbe   : > { %1318 = vmatpush1.bf16.msra.mxu0 %v3434_v20  ;;  %v818_v20 = vld [vmem:[#allocation7 + $0x190] sm:$0xff] }
  0xbf   : > { %1319 = vmatprep.subr.bf16.mxu0 %v3427_v47  ;;  %v3469_v31 = vcombine.high %v818_v20, %v822_v24 }
  0xc1   : > { %704 = vmatmul.mubr.bf16.gmra.mxu0 %v502_v21 }
  0xc2   : > { %711 = vmatprep.mubr.bf16.mxu0 %v505_v22  ;;  %1320 = vmatpush1.bf16.msra.mxu0 %v3426_v46 }
  0xc3   : > { %1321 = vmatprep.subr.bf16.mxu0 %v3419_v59  ;;  %v794_v59 = vld [vmem:[#allocation7 + $0xd0] sm:$0xff] }
  0xc6   : > { %1322 = vmatpush1.bf16.msra.mxu0 %v3418_v61 }
  0xc7   : > { %1533 = vmatprep.subr.bf16.mxu0 %v3479_v8  ;;  %v3447_v8 = vcombine.high %v795_v63, %v799_v1 }
  0xc9   : > { %712 = vmatmul.mubr.bf16.gmra.mxu0 %v504_v27 }
  0xca   : > { %719 = vmatprep.mubr.bf16.mxu0 %v507_v28 }
  0xd1   : > { %720 = vmatmul.mubr.bf16.gmra.mxu0 %v506_v33  ;;  %v814_v33 = vld [vmem:[#allocation7 + $0x170] sm:$0xff] }
  0xd2   : > { %727 = vmatprep.mubr.bf16.mxu0 %v509_v34  ;;  %v811_v34 = vld [vmem:[#allocation7 + $0x158] sm:$0xff]  ;;  %v3461_v42 = vcombine.high %v810_v29, %v814_v33  ;;  %v3460_v54 = vcombine.low %v810_v29, %v814_v33 }
  0xd3   : > { %v3462_v55 = vcombine.low %v811_v34, %v815_v35  ;;  %v779_v29 = vld [vmem:[#allocation7 + $0x58] sm:$0xff] }
  0xd9   : > { %728 = vmatmul.mubr.bf16.gmra.mxu0 %v508_v39  ;;  %v3468_v39 = vcombine.low %v818_v20, %v822_v24  ;;  %v3446_v20 = vcombine.low %v795_v63, %v799_v1  ;;  %v778_v24 = vld [vmem:[#allocation7 + $0x50] sm:$0xff] }
  0xda   : > { %735 = vmatprep.mubr.bf16.mxu0 %v511_v40  ;;  %v3470_v40 = vcombine.low %v819_v25, %v823_v26 }
  0xe1   : > { %736 = vmatmul.mubr.bf16.gmra.mxu0 %v510_v43  ;;  %v3463_v43 = vcombine.high %v811_v34, %v815_v35 }
  0xe2   : > { %1339 = vmatprep.mubr.bf16.mxu0 %v4388_v0 }
 0x169   : > { %v3588_v9 = vpop.f32.mrf.mxu0 }
 0x16b   : > { %v3589_v10 = vpop.f32.mrf.mxu0 }
 0x16c   : > { %v3590_v11 = vadd.f32 %v3589_v10, %v3588_v9  ;;  %v786_v9 = vld [vmem:[#allocation7 + $0x90] sm:$0xff] }
 0x16d   : > { %v3591_v13 = vpop.f32.mrf.mxu0 }
 0x16e   : > { %v682_v15 = vadd.f32 %v3590_v11, %v4669_v12 }
 0x16f   : > { %v3592_v14 = vpop.f32.mrf.mxu0 }
 0x170   : > { %v3593_v16 = vadd.f32 %v3592_v14, %v3591_v13  ;;  %v744_v21 = vmax.f32 %v682_v15, 0.0  ;;  %v790_v14 = vld [vmem:[#allocation7 + $0xb0] sm:$0xff]  ;;  %v787_v15 = vld [vmem:[#allocation7 + $0x98] sm:$0xff] }
 0x171   : > { %v3594_v17 = vpop.f32.mrf.mxu0  ;;  %v3436_v33 = vcombine.low %v786_v9, %v790_v14 }
 0x172   : > { %v685_v18 = vadd.f32 %v3593_v16, %v4669_v12  ;;  %v791_v16 = vld [vmem:[#allocation7 + $0xb8] sm:$0xff] }
 0x173   : > { %v3595_v19 = vpop.f32.mrf.mxu0  ;;  %v3438_v34 = vcombine.low %v787_v15, %v791_v16 }
 0x174   : > { %v745_v22 = vmax.f32 %v685_v18, 0.0  ;;  %v3596_v23 = vadd.f32 %v3595_v19, %v3594_v17  ;;  %v3444_v19 = vcombine.low %v794_v59, %v798_v62 }
 0x175   : > { %v3597_v27 = vpop.f32.mrf.mxu0 }
 0x176   : > { %v4673_v28 = vpack.c.bf16 %v745_v22, %v744_v21  ;;  %v690_v36 = vadd.f32 %v3596_v23, %v4669_v12  ;;  %v3437_v22 = vcombine.high %v786_v9, %v790_v14  ;;  %v3439_v23 = vcombine.high %v787_v15, %v791_v16 }
 0x177   : > { %v3598_v30 = vpop.f32.mrf.mxu0 }
 0x178   : > { %v3599_v37 = vadd.f32 %v3598_v30, %v3597_v27  ;;  %1227 = vmatmul.mubr.bf16.vlgmr.msra.gmra.mxu1 %v4673_v28  ;;  %1340 = vmatmul.mubr.bf16.vlgmr.msra.gmra.mxu0 %v4673_v28  ;;  %v746_v46 = vmax.f32 %v690_v36, 0.0  ;;  %v782_v27 = vld [vmem:[#allocation7 + $0x70] sm:$0xff]  ;;  %v783_v30 = vld [vmem:[#allocation7 + $0x78] sm:$0xff] }
 0x179   : > { %1421 = vmatpush1.bf16.msra.mxu1 %v3476_v4  ;;  %v3600_v38 = vpop.f32.mrf.mxu0  ;;  %1534 = vmatpush1.bf16.msra.mxu0 %v3478_v7  ;;  %v3452_v4 = vcombine.low %v802_v45, %v806_v49  ;;  %v3445_v7 = vcombine.high %v794_v59, %v798_v62  ;;  %v3429_v36 = vcombine.high %v778_v24, %v782_v27 }
 0x17a   : > { %v693_v41 = vadd.f32 %v3599_v37, %v4669_v12  ;;  %1236 = vmatprep.mubr.bf16.mxu1 %v4388_v0  ;;  %1349 = vmatprep.mubr.bf16.mxu0 %v4388_v0  ;;  %v3431_v37 = vcombine.high %v779_v29, %v783_v30 }
 0x17b   : > { %v3601_v44 = vpop.f32.mrf.mxu0  ;;  %1422 = vmatprep.subr.bf16.mxu1 %v3469_v31  ;;  %1535 = vmatprep.subr.bf16.mxu0 %v3471_v32 }
 0x17c   : > { %v747_v47 = vmax.f32 %v693_v41, 0.0  ;;  %v3602_v48 = vadd.f32 %v3601_v44, %v3600_v38  ;;  %v770_v38 = vld [vmem:[#allocation7 + $0x10] sm:$0xff]  ;;  %v775_v44 = vld [vmem:[#allocation7 + $0x38] sm:$0xff] }
 0x17d   : > { %v3603_v52 = vpop.f32.mrf.mxu0  ;;  %1423 = vmatpush1.bf16.msra.mxu1 %v3468_v39  ;;  %1536 = vmatpush1.bf16.msra.mxu0 %v3470_v40 }
 0x17e   : > { %v4681_v53 = vpack.c.bf16 %v747_v47, %v746_v46  ;;  %1424 = vmatprep.subr.bf16.mxu1 %v3461_v42  ;;  %1537 = vmatprep.subr.bf16.mxu0 %v3463_v43  ;;  %v698_v60 = vadd.f32 %v3602_v48, %v4669_v12  ;;  %v774_v42 = vld [vmem:[#allocation7 + $0x30] sm:$0xff]  ;;  %v771_v43 = vld [vmem:[#allocation7 + $0x18] sm:$0xff]  ;;  %v3428_v47 = vcombine.low %v778_v24, %v782_v27 }
 0x17f   : > { %v3604_v56 = vpop.f32.mrf.mxu0  ;;  %v3430_v48 = vcombine.low %v779_v29, %v783_v30  ;;  %v3421_v50 = vcombine.high %v770_v38, %v774_v42  ;;  %v3423_v51 = vcombine.high %v771_v43, %v775_v44 }
 0x180   : > { %v3605_v61 = vadd.f32 %v3604_v56, %v3603_v52  ;;  %1237 = vmatmul.mubr.bf16.gmra.mxu1 %v4681_v53  ;;  %1350 = vmatmul.mubr.bf16.gmra.mxu0 %v4681_v53  ;;  %v748_v10 = vmax.f32 %v698_v60, 0.0  ;;  %v4018_v60 = vld [vmem:[#allocation10 + $0x78] sm:$0xff]  }
 0x181   : > { %v3606_v2 = vpop.f32.mrf.mxu0  ;;  %1246 = vmatprep.mubr.bf16.mxu1 %v4388_v0  ;;  %1359 = vmatprep.mubr.bf16.mxu0 %v4388_v0 }
 0x182   : > { %v701_v3 = vadd.f32 %v3605_v61, %v4669_v12  ;;  %1425 = vmatpush1.bf16.msra.mxu1 %v3460_v54  ;;  %1538 = vmatpush1.bf16.msra.mxu0 %v3462_v55  ;;  %v4020_v61 = vld [vmem:[#allocation10 + $0xf8] sm:$0xff]  }
 0x183   : > { %v3607_v6 = vpop.f32.mrf.mxu0  ;;  %1426 = vmatprep.subr.bf16.mxu1 %v3453_v57  ;;  %1539 = vmatprep.subr.bf16.mxu0 %v3455_v58  ;;  %v3420_v57 = vcombine.low %v770_v38, %v774_v42  ;;  %v3422_v58 = vcombine.low %v771_v43, %v775_v44  ;;  %v4022_v38 = vld [vmem:[#allocation10 + $0x70] sm:$0xff]   ;;  %v4028_v42 = vld [vmem:[#allocation10 + $0xe8] sm:$0xff]  }
 0x184   : > { %v749_v11 = vmax.f32 %v701_v3, 0.0  ;;  %v3608_v13 = vadd.f32 %v3607_v6, %v3606_v2  ;;  %v4027_v43 = vld [vmem:[#allocation10 + $0x28] sm:$0xff]  }
 0x185   : > { %v3609_v17 = vpop.f32.mrf.mxu0  ;;  %v4029_v44 = vld [vmem:[#allocation10 + $0xa8] sm:$0xff]  }
 0x186   : > { %v4689_v18 = vpack.c.bf16 %v749_v11, %v748_v10  ;;  %1427 = vmatpush1.bf16.msra.mxu1 %v3452_v4  ;;  %1540 = vmatpush1.bf16.msra.mxu0 %v3454_v5  ;;  %v706_v25 = vadd.f32 %v3608_v13, %v4669_v12 }
 0x187   : > { %v3610_v21 = vpop.f32.mrf.mxu0  ;;  %1428 = vmatprep.subr.bf16.mxu1 %v3445_v7  ;;  %1541 = vmatprep.subr.bf16.mxu0 %v3447_v8 }
 0x188   : > { %v3611_v26 = vadd.f32 %v3610_v21, %v3609_v17  ;;  %1247 = vmatmul.mubr.bf16.gmra.mxu1 %v4689_v18  ;;  %1360 = vmatmul.mubr.bf16.gmra.mxu0 %v4689_v18  ;;  %v750_v39 = vmax.f32 %v706_v25, 0.0 }
 0x189   : > { %v3612_v31 = vpop.f32.mrf.mxu0  ;;  %1256 = vmatprep.mubr.bf16.mxu1 %v4388_v0  ;;  %1369 = vmatprep.mubr.bf16.mxu0 %v4388_v0 }
 0x18a   : > { %v709_v32 = vadd.f32 %v3611_v26, %v4669_v12  ;;  %1429 = vmatpush1.bf16.msra.mxu1 %v3444_v19  ;;  %1542 = vmatpush1.bf16.msra.mxu0 %v3446_v20 }
 0x18b   : > { %v3613_v35 = vpop.f32.mrf.mxu0  ;;  %1430 = vmatprep.subr.bf16.mxu1 %v3437_v22  ;;  %1543 = vmatprep.subr.bf16.mxu0 %v3439_v23 }
 0x18c   : > { %v751_v40 = vmax.f32 %v709_v32, 0.0  ;;  %v3614_v41 = vadd.f32 %v3613_v35, %v3612_v31 }
 0x18d   : > { %v3615_v45 = vpop.f32.mrf.mxu0 }
 0x18e   : > { %v4697_v46 = vpack.c.bf16 %v751_v40, %v750_v39  ;;  %1431 = vmatpush1.bf16.msra.mxu1 %v3436_v33  ;;  %1544 = vmatpush1.bf16.msra.mxu0 %v3438_v34  ;;  %v714_v52 = vadd.f32 %v3614_v41, %v4669_v12  ;;  %v4024_v39 = vld [vmem:[#allocation10 + $0xf0] sm:$0xff]   ;;  %v4026_v41 = vld [vmem:[#allocation10 + $0x68] sm:$0xff]  }
 0x18f   : > { %v3616_v49 = vpop.f32.mrf.mxu0  ;;  %1432 = vmatprep.subr.bf16.mxu1 %v3429_v36  ;;  %1545 = vmatprep.subr.bf16.mxu0 %v3431_v37  ;;  %v4019_v36 = vld [vmem:[#allocation10 + $0x38] sm:$0xff]   ;;  %v4025_v40 = vld [vmem:[#allocation10 + $0xb0] sm:$0xff]  }
 0x190   : > { %v3617_v54 = vadd.f32 %v3616_v49, %v3615_v45  ;;  %1257 = vmatmul.mubr.bf16.gmra.mxu1 %v4697_v46  ;;  %1370 = vmatmul.mubr.bf16.gmra.mxu0 %v4697_v46  ;;  %v752_v62 = vmax.f32 %v714_v52, 0.0  ;;  %v4021_v37 = vld [vmem:[#allocation10 + $0xb8] sm:$0xff]   ;;  %v4030_v45 = vld [vmem:[#allocation10 + $0x60] sm:$0xff]  }
 0x191   : > { %v3618_v55 = vpop.f32.mrf.mxu0  ;;  %1266 = vmatprep.mubr.bf16.mxu1 %v4388_v0  ;;  %1379 = vmatprep.mubr.bf16.mxu0 %v4388_v0  ;;  %v4034_v49 = vld [vmem:[#allocation10 + $0x58] sm:$0xff]  }
 0x192   : > { %v717_v56 = vadd.f32 %v3617_v54, %v4669_v12  ;;  %1433 = vmatpush1.bf16.msra.mxu1 %v3428_v47  ;;  %1546 = vmatpush1.bf16.msra.mxu0 %v3430_v48  ;;  %v4031_v47 = vld [vmem:[#allocation10 + $0x20] sm:$0xff]   ;;  %v4037_v52 = vld [vmem:[#allocation10 + $0x98] sm:$0xff]   ;;  %v4038_v54 = vld [vmem:[#allocation10 + $0x50] sm:$0xff]  }
 0x193   : > { %v3619_v59 = vpop.f32.mrf.mxu0  ;;  %1434 = vmatprep.subr.bf16.mxu1 %v3421_v50  ;;  %1547 = vmatprep.subr.bf16.mxu0 %v3423_v51  ;;  %v4033_v48 = vld [vmem:[#allocation10 + $0xa0] sm:$0xff]   ;;  %v4036_v50 = vld [vmem:[#allocation10 + $0xd8] sm:$0xff]  }
 0x194   : > { %v753_v63 = vmax.f32 %v717_v56, 0.0  ;;  %v3620_v1 = vadd.f32 %v3619_v59, %v3618_v55  ;;  %v4035_v51 = vld [vmem:[#allocation10 + $0x18] sm:$0xff]   ;;  %v4039_v55 = vld [vmem:[#allocation10 + $0x10] sm:$0xff]   ;;  %v4043_v59 = vld [vmem:[#allocation10 + $0x8] sm:$0xff]  }
 0x195   : > { %v3621_v2 = vpop.f32.mrf.mxu0  ;;  %v4041_v56 = vld [vmem:[#allocation10 + $0x90] sm:$0xff]  }
 0x196   : > { %v4705_v3 = vpack.c.bf16 %v753_v63, %v752_v62  ;;  %1435 = vmatpush1.bf16.msra.mxu1 %v3420_v57  ;;  %1548 = vmatpush1.bf16.msra.mxu0 %v3422_v58  ;;  %v722_v5 = vadd.f32 %v3620_v1, %v4669_v12  ;;  %v4042_v57 = vld [vmem:[#allocation10 + $0x48] sm:$0xff]   ;;  %v4047_v62 = vld [vmem:[#allocation10] sm:$0xff]   ;;  %v4050_v1 = vld [vmem:[#allocation10 + $0x178] sm:$0xff]  }
 0x197   : > { %v3622_v4 = vpop.f32.mrf.mxu0  ;;  %3636 = vmatprep.subr.bf16.mxu1 %v4018_v60  ;;  %3700 = vmatprep.subr.bf16.mxu0 %v4020_v61  ;;  %v4044_v58 = vld [vmem:[#allocation10 + $0xc8] sm:$0xff]   ;;  %v4046_v61 = vld [vmem:[#allocation10 + $0x40] sm:$0xff]  }
 0x198   : > { %v3623_v6 = vadd.f32 %v3622_v4, %v3621_v2  ;;  %1267 = vmatmul.mubr.bf16.gmra.mxu1 %v4705_v3  ;;  %1380 = vmatmul.mubr.bf16.gmra.mxu0 %v4705_v3  ;;  %v754_v10 = vmax.f32 %v722_v5, 0.0  ;;  %v4045_v60 = vld [vmem:[#allocation10 + $0x88] sm:$0xff]   ;;  %v4049_v63 = vld [vmem:[#allocation10 + $0x80] sm:$0xff]   ;;  %v4052_v2 = vld [vmem:[#allocation10 + $0x1f8] sm:$0xff]  }
 0x199   : > { %v3624_v7 = vpop.f32.mrf.mxu0  ;;  %1276 = vmatprep.mubr.bf16.mxu1 %v4388_v0  ;;  %1389 = vmatprep.mubr.bf16.mxu0 %v4388_v0 }
 0x19a   : > { %v725_v8 = vadd.f32 %v3623_v6, %v4669_v12 }
 0x19b   : > { %v3625_v9 = vpop.f32.mrf.mxu0 }
 0x19c   : > { %v755_v11 = vmax.f32 %v725_v8, 0.0  ;;  %v3626_v13 = vadd.f32 %v3625_v9, %v3624_v7  ;;  %v4771_v8 = vld [vmem:[#allocation8] sm:$0xff] }
 0x19d   : > { %v3627_v14 = vpop.f32.mrf.mxu0 }
 0x19e   : > { %v4713_v15 = vpack.c.bf16 %v755_v11, %v754_v10  ;;  %v730_v17 = vadd.f32 %v3626_v13, %v4669_v12 }
 0x19f   : > { %v3628_v16 = vpop.f32.mrf.mxu0 }
 0x1a0   : > { %v3629_v19 = vadd.f32 %v3628_v16, %v3627_v14  ;;  %1277 = vmatmul.mubr.bf16.gmra.mxu1 %v4713_v15  ;;  %1390 = vmatmul.mubr.bf16.gmra.mxu0 %v4713_v15  ;;  %v756_v23 = vmax.f32 %v730_v17, 0.0 }
 0x1a1   : > { %v3630_v20 = vpop.f32.mrf.mxu0  ;;  %1286 = vmatprep.mubr.bf16.mxu1 %v4388_v0  ;;  %1399 = vmatprep.mubr.bf16.mxu0 %v4388_v0 }
 0x1a2   : > { %v733_v21 = vadd.f32 %v3629_v19, %v4669_v12 }
 0x1a3   : > { %v3631_v22 = vpop.f32.mrf.mxu0 }
 0x1a4   : > { %v757_v24 = vmax.f32 %v733_v21, 0.0  ;;  %v3632_v25 = vadd.f32 %v3631_v22, %v3630_v20 }
 0x1a5   : > { %v3633_v26 = vpop.f32.mrf.mxu0 }
 0x1a6   : > { %v4721_v27 = vpack.c.bf16 %v757_v24, %v756_v23  ;;  %v738_v30 = vadd.f32 %v3632_v25, %v4669_v12 }
 0x1a7   : > { %v3634_v29 = vpop.f32.mrf.mxu0 }
 0x1a8   : > { %v3635_v31 = vadd.f32 %v3634_v29, %v3633_v26  ;;  %1287 = vmatmul.mubr.bf16.gmra.mxu1 %v4721_v27  ;;  %1400 = vmatmul.mubr.bf16.gmra.mxu0 %v4721_v27  ;;  %v758_v33 = vmax.f32 %v738_v30, 0.0 }
 0x1a9   : > { %1296 = vmatprep.mubr.bf16.mxu1 %v4388_v0  ;;  %1409 = vmatprep.mubr.bf16.mxu0 %v4388_v0 }
 0x1aa   : > { %v741_v32 = vadd.f32 %v3635_v31, %v4669_v12  ;;  %v4023_v12 = vld [vmem:[#allocation10 + $0x30] sm:$0xff]  }
 0x1ac   : > { %v759_v34 = vmax.f32 %v741_v32, 0.0 }
 0x1ae   : > { %v4729_v35 = vpack.c.bf16 %v759_v34, %v758_v33 }
 0x1b0   : > { %1297 = vmatmul.mubr.bf16.gmra.mxu1 %v4729_v35  ;;  %1410 = vmatmul.mubr.bf16.gmra.mxu0 %v4729_v35 }
 0x1b1   : > { %1452 = vmatprep.mubr.bf16.mxu1 %v4388_v0  ;;  %1565 = vmatprep.mubr.bf16.mxu0 %v4388_v0 }
 0x1b8   : > { %1453 = vmatmul.mubr.bf16.vlgmr.msra.gmra.mxu1 %v4673_v28  ;;  %1566 = vmatmul.mubr.bf16.vlgmr.msra.gmra.mxu0 %v4673_v28  ;;  %v4032_v28 = vld [vmem:[#allocation10 + $0xe0] sm:$0xff]  }
 0x1b9   : > { %1462 = vmatprep.mubr.bf16.mxu1 %v4388_v0  ;;  %1575 = vmatprep.mubr.bf16.mxu0 %v4388_v0 }
 0x1ba   : > { %3637 = vmatpush3.bf16.msra.mxu1 %v4019_v36  ;;  %3701 = vmatpush3.bf16.msra.mxu0 %v4021_v37 }
 0x1bb   : > { %3638 = vmatprep.subr.bf16.mxu1 %v4022_v38  ;;  %3702 = vmatprep.subr.bf16.mxu0 %v4024_v39 }
 0x1be   : > { %3639 = vmatpush3.bf16.msra.mxu1 %v4023_v12  ;;  %3703 = vmatpush3.bf16.msra.mxu0 %v4025_v40 }
 0x1bf   : > { %3640 = vmatprep.subr.bf16.mxu1 %v4026_v41  ;;  %3704 = vmatprep.subr.bf16.mxu0 %v4028_v42 }
 0x1c0   : > { %1463 = vmatmul.mubr.bf16.gmra.mxu1 %v4681_v53  ;;  %1576 = vmatmul.mubr.bf16.gmra.mxu0 %v4681_v53  ;;  %v4040_v53 = vld [vmem:[#allocation10 + $0xd0] sm:$0xff]  }
 0x1c1   : > { %1472 = vmatprep.mubr.bf16.mxu1 %v4388_v0  ;;  %1585 = vmatprep.mubr.bf16.mxu0 %v4388_v0 }
 0x1c2   : > { %3641 = vmatpush3.bf16.msra.mxu1 %v4027_v43  ;;  %3705 = vmatpush3.bf16.msra.mxu0 %v4029_v44 }
 0x1c3   : > { %3642 = vmatprep.subr.bf16.mxu1 %v4030_v45  ;;  %3706 = vmatprep.subr.bf16.mxu0 %v4032_v28  ;;  %v4051_v45 = vld [vmem:[#allocation10 + $0x138] sm:$0xff]  }
 0x1c4   : > { %v4053_v28 = vld [vmem:[#allocation10 + $0x1b8] sm:$0xff]  }
 0x1c6   : > { %3643 = vmatpush3.bf16.msra.mxu1 %v4031_v47  ;;  %3707 = vmatpush3.bf16.msra.mxu0 %v4033_v48 }
 0x1c7   : > { %3644 = vmatprep.subr.bf16.mxu1 %v4034_v49  ;;  %3708 = vmatprep.subr.bf16.mxu0 %v4036_v50 }
 0x1c8   : > { %1473 = vmatmul.mubr.bf16.gmra.mxu1 %v4689_v18  ;;  %1586 = vmatmul.mubr.bf16.gmra.mxu0 %v4689_v18  ;;  %v4048_v18 = vld [vmem:[#allocation10 + $0xc0] sm:$0xff]  }
 0x1c9   : > { %1482 = vmatprep.mubr.bf16.mxu1 %v4388_v0  ;;  %1595 = vmatprep.mubr.bf16.mxu0 %v4388_v0 }
 0x1ca   : > { %3645 = vmatpush3.bf16.msra.mxu1 %v4035_v51  ;;  %3709 = vmatpush3.bf16.msra.mxu0 %v4037_v52  ;;  %v4054_v52 = vld [vmem:[#allocation10 + $0x170] sm:$0xff]  }
 0x1cb   : > { %3646 = vmatprep.subr.bf16.mxu1 %v4038_v54  ;;  %3710 = vmatprep.subr.bf16.mxu0 %v4040_v53  ;;  %v4056_v54 = vld [vmem:[#allocation10 + $0x1f0] sm:$0xff]  }
 0x1ce   : > { %3647 = vmatpush3.bf16.msra.mxu1 %v4039_v55  ;;  %3711 = vmatpush3.bf16.msra.mxu0 %v4041_v56 }
 0x1cf   : > { %3648 = vmatprep.subr.bf16.mxu1 %v4042_v57  ;;  %3712 = vmatprep.subr.bf16.mxu0 %v4044_v58 }
 0x1d0   : > { %1483 = vmatmul.mubr.bf16.gmra.mxu1 %v4697_v46  ;;  %1596 = vmatmul.mubr.bf16.gmra.mxu0 %v4697_v46  ;;  %v834_v46 = vlaneseq }
 0x1d1   : > { %1492 = vmatprep.mubr.bf16.mxu1 %v4388_v0  ;;  %1605 = vmatprep.mubr.bf16.mxu0 %v4388_v0 }
 0x1d2   : > { %3649 = vmatpush3.bf16.msra.mxu1 %v4043_v59  ;;  %3713 = vmatpush3.bf16.msra.mxu0 %v4045_v60 }
 0x1d3   : > { %3650 = vmatprep.subr.bf16.mxu1 %v4046_v61  ;;  %3714 = vmatprep.subr.bf16.mxu0 %v4048_v18 }
 0x1d6   : > { %3651 = vmatpush3.bf16.msra.mxu1 %v4047_v62  ;;  %3715 = vmatpush3.bf16.msra.mxu0 %v4049_v63  ;;  %v4055_v62 = vld [vmem:[#allocation10 + $0x130] sm:$0xff]  }
 0x1d7   : > { %3764 = vmatprep.subr.bf16.mxu1 %v4050_v1  ;;  %3828 = vmatprep.subr.bf16.mxu0 %v4052_v2 }
 0x1d8   : > { %1493 = vmatmul.mubr.bf16.gmra.mxu1 %v4705_v3  ;;  %1606 = vmatmul.mubr.bf16.gmra.mxu0 %v4705_v3  ;;  %v4765_v3 = vshrl.u32 %v834_v46, 7 }
 0x1d9   : > { %1502 = vmatprep.mubr.bf16.mxu1 %v4388_v0  ;;  %1615 = vmatprep.mubr.bf16.mxu0 %v4388_v0 }
 0x1da   : > { %v5329_v4 = vsub.s32 1, %v4765_v3  ;;  %v848_v5 = vsub.s32 3, %v4765_v3  ;;  %v836_v6 = vsub.s32 0, %v4765_v3  ;;  %v844_v7 = vsub.s32 2, %v4765_v3 }
 0x1dc   : > { %v4776_v11 = vrot.slane %v4771_v8, %v5329_v4  ;;  %v4779_v13 = vrot.slane %v4771_v8, %v848_v5  ;;  %v4784_v14 = vrot.slane %v4771_v8, %v836_v6  ;;  %v4057_v5 = vld [vmem:[#allocation10 + $0x1b0] sm:$0xff]  }
 0x1e0   : > { %1503 = vmatmul.mubr.bf16.gmra.mxu1 %v4713_v15  ;;  %1616 = vmatmul.mubr.bf16.gmra.mxu0 %v4713_v15  ;;  %v4787_v15 = vrot.slane %v4771_v8, %v844_v7  ;;  %v4058_v7 = vld [vmem:[#allocation10 + $0x168] sm:$0xff]  }
 0x1e1   : > { %1512 = vmatprep.mubr.bf16.mxu1 %v4388_v0  ;;  %1625 = vmatprep.mubr.bf16.mxu0 %v4388_v0 }
 0x1e8   : > { %1513 = vmatmul.mubr.bf16.gmra.mxu1 %v4721_v27  ;;  %1626 = vmatmul.mubr.bf16.gmra.mxu0 %v4721_v27 }
 0x1e9   : > { %1522 = vmatprep.mubr.bf16.mxu1 %v4388_v0  ;;  %1635 = vmatprep.mubr.bf16.mxu0 %v4388_v0 }
 0x1f0   : > { %1523 = vmatmul.mubr.bf16.gmra.mxu1 %v4729_v35  ;;  %1636 = vmatmul.mubr.bf16.gmra.mxu0 %v4729_v35 }
 0x238   : > { %v1228_v9 = vpop.f32.mrf.mxu1  ;;  %v1341_v10 = vpop.f32.mrf.mxu0 }
 0x239   : > { %v1229_v25 = vadd.f32 %v1228_v9, %v4784_v14  ;;  %v1342_v26 = vadd.f32 %v1341_v10, %v4787_v15 }
 0x23a   : > { %v1230_v16 = vpop.f32.mrf.mxu1  ;;  %v1343_v17 = vpop.f32.mrf.mxu0 }
 0x23b   : > { %v1231_v21 = vadd.f32 %v1230_v16, %v4776_v11  ;;  %v1344_v22 = vadd.f32 %v1343_v17, %v4779_v13  ;;  %v1646_v12 = vmax.f32 %v1229_v25, 0.0  ;;  %v1648_v40 = vmax.f32 %v1342_v26, 0.0  ;;  %v4059_v25 = vld [vmem:[#allocation10 + $0x128] sm:$0xff]  }
 0x23c   : > { %v1232_v19 = vpop.f32.mrf.mxu1  ;;  %v1345_v20 = vpop.f32.mrf.mxu0  ;;  %v4060_v26 = vld [vmem:[#allocation10 + $0x1e8] sm:$0xff]  }
 0x23d   : > { %v1233_v23 = vadd.f32 %v1232_v19, %v4784_v14  ;;  %v1346_v24 = vadd.f32 %v1345_v20, %v4787_v15  ;;  %v1647_v36 = vmax.f32 %v1231_v21, 0.0  ;;  %v1649_v37 = vmax.f32 %v1344_v22, 0.0 }
 0x23e   : > { %v1234_v27 = vpop.f32.mrf.mxu1  ;;  %v1347_v29 = vpop.f32.mrf.mxu0 }
 0x23f   : > { %v1235_v30 = vadd.f32 %v1234_v27, %v4776_v11  ;;  %v1348_v31 = vadd.f32 %v1347_v29, %v4779_v13  ;;  %v1654_v32 = vmax.f32 %v1233_v23, 0.0  ;;  %v1656_v33 = vmax.f32 %v1346_v24, 0.0 }
 0x240   : > { %v1238_v34 = vpop.f32.mrf.mxu1  ;;  %v1351_v35 = vpop.f32.mrf.mxu0 }
 0x241   : > { %v1655_v38 = vmax.f32 %v1235_v30, 0.0  ;;  %v1657_v39 = vmax.f32 %v1348_v31, 0.0  ;;  %v1774_v47 = vpack.c.bf16 %v1654_v32, %v1646_v12  ;;  %v1776_v48 = vpack.c.bf16 %v1656_v33, %v1648_v40  ;;  %v4061_v33 = vld [vmem:[#allocation10 + $0x1a8] sm:$0xff]  }
 0x242   : > { %v1240_v41 = vpop.f32.mrf.mxu1  ;;  %v1353_v42 = vpop.f32.mrf.mxu0  ;;  %v1239_v57 = vadd.f32 %v1238_v34, %v4784_v14  ;;  %v1352_v58 = vadd.f32 %v1351_v35, %v4787_v15  ;;  %v4062_v34 = vld [vmem:[#allocation10 + $0x160] sm:$0xff]  }
 0x243   : > { %v1775_v43 = vpack.c.bf16 %v1655_v38, %v1647_v36  ;;  %v1777_v44 = vpack.c.bf16 %v1657_v39, %v1649_v37  ;;  %v1241_v49 = vadd.f32 %v1240_v41, %v4776_v11  ;;  %v1354_v53 = vadd.f32 %v1353_v42, %v4779_v13  ;;  %v4064_v38 = vld [vmem:[#allocation10 + $0x1e0] sm:$0xff]  }
 0x244   : > { %v1242_v50 = vpop.f32.mrf.mxu1  ;;  %v1355_v51 = vpop.f32.mrf.mxu0  ;;  %v1662_v19 = vmax.f32 %v1239_v57, 0.0  ;;  %v1664_v20 = vmax.f32 %v1352_v58, 0.0 }
 0x245   : > { %v1243_v55 = vadd.f32 %v1242_v50, %v4784_v14  ;;  %v1356_v56 = vadd.f32 %v1355_v51, %v4787_v15  ;;  %2389 = vmatprep.mubr.bf16.mxu1 %v1775_v43  ;;  %2486 = vmatprep.mubr.bf16.mxu0 %v1777_v44  ;;  %v1663_v9 = vmax.f32 %v1241_v49, 0.0  ;;  %v1665_v10 = vmax.f32 %v1354_v53, 0.0  ;;  %v4063_v44 = vld [vmem:[#allocation10 + $0x120] sm:$0xff]   ;;  %v4066_v50 = vld [vmem:[#allocation10 + $0x158] sm:$0xff]  }
 0x246   : > { %v1244_v59 = vpop.f32.mrf.mxu1  ;;  %v1357_v60 = vpop.f32.mrf.mxu0  ;;  %2390 = vmatmul.mubr.bf16.vlgmr.msra.gmra.mxu1 %v1774_v47  ;;  %2487 = vmatmul.mubr.bf16.vlgmr.msra.gmra.mxu0 %v1776_v48  ;;  %v4065_v49 = vld [vmem:[#allocation10 + $0x1a0] sm:$0xff]  }
 0x247   : > { %v1245_v61 = vadd.f32 %v1244_v59, %v4776_v11  ;;  %v1358_v18 = vadd.f32 %v1357_v60, %v4779_v13  ;;  %3765 = vmatpush3.bf16.msra.mxu1 %v4051_v45  ;;  %3829 = vmatpush3.bf16.msra.mxu0 %v4053_v28  ;;  %v1670_v63 = vmax.f32 %v1243_v55, 0.0  ;;  %v1672_v1 = vmax.f32 %v1356_v56, 0.0 }
 0x248   : > { %v1248_v2 = vpop.f32.mrf.mxu1  ;;  %v1361_v46 = vpop.f32.mrf.mxu0  ;;  %3766 = vmatprep.subr.bf16.mxu1 %v4054_v52  ;;  %3830 = vmatprep.subr.bf16.mxu0 %v4056_v54 }
 0x249   : > { %v1671_v16 = vmax.f32 %v1245_v61, 0.0  ;;  %v1673_v17 = vmax.f32 %v1358_v18, 0.0  ;;  %v1782_v27 = vpack.c.bf16 %v1670_v63, %v1662_v19  ;;  %v1784_v29 = vpack.c.bf16 %v1672_v1, %v1664_v20  ;;  %v4067_v61 = vld [vmem:[#allocation10 + $0x118] sm:$0xff]  }
 0x24a   : > { %v1250_v21 = vpop.f32.mrf.mxu1  ;;  %v1363_v22 = vpop.f32.mrf.mxu0  ;;  %v1249_v39 = vadd.f32 %v1248_v2, %v4784_v14  ;;  %v1362_v12 = vadd.f32 %v1361_v46, %v4787_v15  ;;  %v4068_v18 = vld [vmem:[#allocation10 + $0x1d8] sm:$0xff]  }
 0x24b   : > { %v1783_v23 = vpack.c.bf16 %v1671_v16, %v1663_v9  ;;  %v1785_v24 = vpack.c.bf16 %v1673_v17, %v1665_v10  ;;  %3767 = vmatpush3.bf16.msra.mxu1 %v4055_v62  ;;  %v1251_v30 = vadd.f32 %v1250_v21, %v4776_v11  ;;  %3831 = vmatpush3.bf16.msra.mxu0 %v4057_v5  ;;  %v4069_v5 = vld [vmem:[#allocation10 + $0x198] sm:$0xff]   ;;  %v4072_v17 = vld [vmem:[#allocation10 + $0x1d0] sm:$0xff]  }
 0x24c   : > { %v1252_v31 = vpop.f32.mrf.mxu1  ;;  %v1365_v32 = vpop.f32.mrf.mxu0  ;;  %3768 = vmatprep.subr.bf16.mxu1 %v4058_v7  ;;  %v1364_v35 = vadd.f32 %v1363_v22, %v4779_v13  ;;  %3832 = vmatprep.subr.bf16.mxu0 %v4060_v26  ;;  %v1678_v55 = vmax.f32 %v1249_v39, 0.0  ;;  %v1680_v56 = vmax.f32 %v1362_v12, 0.0  ;;  %v4070_v7 = vld [vmem:[#allocation10 + $0x150] sm:$0xff]  }
 0x24d   : > { %v1253_v36 = vadd.f32 %v1252_v31, %v4784_v14  ;;  %v1366_v37 = vadd.f32 %v1365_v32, %v4787_v15  ;;  %2397 = vmatprep.mubr.bf16.mxu1 %v1783_v23  ;;  %2494 = vmatprep.mubr.bf16.mxu0 %v1785_v24  ;;  %v1679_v51 = vmax.f32 %v1251_v30, 0.0  ;;  %v4073_v31 = vld [vmem:[#allocation10 + $0x190] sm:$0xff]   ;;  %v4074_v32 = vld [vmem:[#allocation10 + $0x148] sm:$0xff]  }
 0x24e   : > { %v1254_v40 = vpop.f32.mrf.mxu1  ;;  %v1367_v41 = vpop.f32.mrf.mxu0  ;;  %2398 = vmatmul.mubr.bf16.gmra.mxu1 %v1782_v27  ;;  %2495 = vmatmul.mubr.bf16.gmra.mxu0 %v1784_v29  ;;  %v1681_v52 = vmax.f32 %v1364_v35, 0.0 }
 0x24f   : > { %v1255_v42 = vadd.f32 %v1254_v40, %v4776_v11  ;;  %v1368_v43 = vadd.f32 %v1367_v41, %v4779_v13  ;;  %3769 = vmatpush3.bf16.msra.mxu1 %v4059_v25  ;;  %v1686_v45 = vmax.f32 %v1253_v36, 0.0  ;;  %v1688_v28 = vmax.f32 %v1366_v37, 0.0  ;;  %3833 = vmatpush3.bf16.msra.mxu0 %v4061_v33  ;;  %v4071_v25 = vld [vmem:[#allocation10 + $0x110] sm:$0xff]  }
 0x250   : > { %v1258_v47 = vpop.f32.mrf.mxu1  ;;  %v1371_v48 = vpop.f32.mrf.mxu0  ;;  %3770 = vmatprep.subr.bf16.mxu1 %v4062_v34  ;;  %3834 = vmatprep.subr.bf16.mxu0 %v4064_v38 }
 0x251   : > { %v1687_v54 = vmax.f32 %v1255_v42, 0.0  ;;  %v1689_v53 = vmax.f32 %v1368_v43, 0.0  ;;  %v1790_v62 = vpack.c.bf16 %v1686_v45, %v1678_v55  ;;  %v1792_v63 = vpack.c.bf16 %v1688_v28, %v1680_v56  ;;  %v4075_v42 = vld [vmem:[#allocation10 + $0x108] sm:$0xff]  }
 0x252   : > { %v1260_v57 = vpop.f32.mrf.mxu1  ;;  %v1373_v58 = vpop.f32.mrf.mxu0  ;;  %v1259_v19 = vadd.f32 %v1258_v47, %v4784_v14  ;;  %v1372_v20 = vadd.f32 %v1371_v48, %v4787_v15  ;;  %v4076_v43 = vld [vmem:[#allocation10 + $0x1c8] sm:$0xff]  }
 0x253   : > { %v1791_v59 = vpack.c.bf16 %v1687_v54, %v1679_v51  ;;  %v1793_v60 = vpack.c.bf16 %v1689_v53, %v1681_v52  ;;  %3771 = vmatpush3.bf16.msra.mxu1 %v4063_v44  ;;  %v1261_v1 = vadd.f32 %v1260_v57, %v4776_v11  ;;  %3835 = vmatpush3.bf16.msra.mxu0 %v4065_v49  ;;  %v4077_v49 = vld [vmem:[#allocation10 + $0x188] sm:$0xff]   ;;  %v4080_v53 = vld [vmem:[#allocation10 + $0x1c0] sm:$0xff]  }
 0x254   : > { %v1262_v2 = vpop.f32.mrf.mxu1  ;;  %v1375_v46 = vpop.f32.mrf.mxu0  ;;  %3772 = vmatprep.subr.bf16.mxu1 %v4066_v50  ;;  %v1374_v9 = vadd.f32 %v1373_v58, %v4779_v13  ;;  %3836 = vmatprep.subr.bf16.mxu0 %v4068_v18  ;;  %v1694_v37 = vmax.f32 %v1259_v19, 0.0  ;;  %v1696_v38 = vmax.f32 %v1372_v20, 0.0  ;;  %v4078_v50 = vld [vmem:[#allocation10 + $0x140] sm:$0xff]  }
 0x255   : > { %v1263_v10 = vadd.f32 %v1262_v2, %v4784_v14  ;;  %v1376_v16 = vadd.f32 %v1375_v46, %v4787_v15  ;;  %2405 = vmatprep.mubr.bf16.mxu1 %v1791_v59  ;;  %2502 = vmatprep.mubr.bf16.mxu0 %v1793_v60  ;;  %v1695_v33 = vmax.f32 %v1261_v1, 0.0  ;;  %v4081_v2 = vld [vmem:[#allocation10 + $0x180] sm:$0xff]  }
 0x256   : > { %v1264_v21 = vpop.f32.mrf.mxu1  ;;  %v1377_v22 = vpop.f32.mrf.mxu0  ;;  %2406 = vmatmul.mubr.bf16.gmra.mxu1 %v1790_v62  ;;  %2503 = vmatmul.mubr.bf16.gmra.mxu0 %v1792_v63  ;;  %v1697_v34 = vmax.f32 %v1374_v9, 0.0 }
 0x257   : > { %v1265_v23 = vadd.f32 %v1264_v21, %v4776_v11  ;;  %v1378_v24 = vadd.f32 %v1377_v22, %v4779_v13  ;;  %3773 = vmatpush3.bf16.msra.mxu1 %v4067_v61  ;;  %v1702_v26 = vmax.f32 %v1263_v10, 0.0  ;;  %v1704_v27 = vmax.f32 %v1376_v16, 0.0  ;;  %3837 = vmatpush3.bf16.msra.mxu0 %v4069_v5  ;;  %v4079_v61 = vld [vmem:[#allocation10 + $0x100] sm:$0xff]  }
 0x258   : > { %v1268_v29 = vpop.f32.mrf.mxu1  ;;  %v1381_v30 = vpop.f32.mrf.mxu0  ;;  %3774 = vmatprep.subr.bf16.mxu1 %v4070_v7  ;;  %3838 = vmatprep.subr.bf16.mxu0 %v4072_v17 }
 0x259   : > { %v1703_v35 = vmax.f32 %v1265_v23, 0.0  ;;  %v1705_v36 = vmax.f32 %v1378_v24, 0.0  ;;  %v1798_v44 = vpack.c.bf16 %v1702_v26, %v1694_v37  ;;  %v1800_v45 = vpack.c.bf16 %v1704_v27, %v1696_v38 }
 0x25a   : > { %v1270_v39 = vpop.f32.mrf.mxu1  ;;  %v1383_v12 = vpop.f32.mrf.mxu0  ;;  %v1269_v55 = vadd.f32 %v1268_v29, %v4784_v14  ;;  %v1382_v56 = vadd.f32 %v1381_v30, %v4787_v15 }
 0x25b   : > { %v1799_v40 = vpack.c.bf16 %v1703_v35, %v1695_v33  ;;  %v1801_v41 = vpack.c.bf16 %v1705_v36, %v1697_v34  ;;  %3775 = vmatpush3.bf16.msra.mxu1 %v4071_v25  ;;  %v1271_v28 = vadd.f32 %v1270_v39, %v4776_v11  ;;  %3839 = vmatpush3.bf16.msra.mxu0 %v4073_v31 }
 0x25c   : > { %v1272_v47 = vpop.f32.mrf.mxu1  ;;  %v1385_v48 = vpop.f32.mrf.mxu0  ;;  %3776 = vmatprep.subr.bf16.mxu1 %v4074_v32  ;;  %v1384_v51 = vadd.f32 %v1383_v12, %v4779_v13  ;;  %3840 = vmatprep.subr.bf16.mxu0 %v4076_v43  ;;  %v1710_v10 = vmax.f32 %v1269_v55, 0.0  ;;  %v1712_v16 = vmax.f32 %v1382_v56, 0.0 }
 0x25d   : > { %v1273_v52 = vadd.f32 %v1272_v47, %v4784_v14  ;;  %v1386_v54 = vadd.f32 %v1385_v48, %v4787_v15  ;;  %2413 = vmatprep.mubr.bf16.mxu1 %v1799_v40  ;;  %2510 = vmatprep.mubr.bf16.mxu0 %v1801_v41  ;;  %v1711_v46 = vmax.f32 %v1271_v28, 0.0 }
 0x25e   : > { %v1274_v57 = vpop.f32.mrf.mxu1  ;;  %v1387_v58 = vpop.f32.mrf.mxu0  ;;  %2414 = vmatmul.mubr.bf16.gmra.mxu1 %v1798_v44  ;;  %2511 = vmatmul.mubr.bf16.gmra.mxu0 %v1800_v45  ;;  %v1713_v5 = vmax.f32 %v1384_v51, 0.0 }
 0x25f   : > { %v1275_v59 = vadd.f32 %v1274_v57, %v4776_v11  ;;  %v1388_v60 = vadd.f32 %v1387_v58, %v4779_v13  ;;  %3777 = vmatpush3.bf16.msra.mxu1 %v4075_v42  ;;  %v1718_v18 = vmax.f32 %v1273_v52, 0.0  ;;  %v1720_v62 = vmax.f32 %v1386_v54, 0.0  ;;  %3841 = vmatpush3.bf16.msra.mxu0 %v4077_v49 }
 0x260   : > { %v1278_v63 = vpop.f32.mrf.mxu1  ;;  %v1391_v1 = vpop.f32.mrf.mxu0  ;;  %3778 = vmatprep.subr.bf16.mxu1 %v4078_v50  ;;  %3842 = vmatprep.subr.bf16.mxu0 %v4080_v53 }
 0x261   : > { %v1719_v7 = vmax.f32 %v1275_v59, 0.0  ;;  %v1721_v9 = vmax.f32 %v1388_v60, 0.0  ;;  %v1806_v22 = vpack.c.bf16 %v1718_v18, %v1710_v10  ;;  %v1808_v23 = vpack.c.bf16 %v1720_v62, %v1712_v16 }
 0x262   : > { %v1280_v17 = vpop.f32.mrf.mxu1  ;;  %v1393_v19 = vpop.f32.mrf.mxu0  ;;  %v1279_v31 = vadd.f32 %v1278_v63, %v4784_v14  ;;  %v1392_v32 = vadd.f32 %v1391_v1, %v4787_v15 }
 0x263   : > { %v1809_v20 = vpack.c.bf16 %v1721_v9, %v1713_v5  ;;  %v1807_v21 = vpack.c.bf16 %v1719_v7, %v1711_v46  ;;  %3779 = vmatpush3.bf16.msra.mxu1 %v4079_v61  ;;  %v1281_v24 = vadd.f32 %v1280_v17, %v4776_v11  ;;  %3843 = vmatpush3.bf16.msra.mxu0 %v4081_v2 }
 0x264   : > { %v1282_v25 = vpop.f32.mrf.mxu1  ;;  %v1395_v26 = vpop.f32.mrf.mxu0  ;;  %v1394_v27 = vadd.f32 %v1393_v19, %v4779_v13  ;;  %v1726_v44 = vmax.f32 %v1279_v31, 0.0  ;;  %v1728_v45 = vmax.f32 %v1392_v32, 0.0 }
 0x265   : > { %v1283_v29 = vadd.f32 %v1282_v25, %v4784_v14  ;;  %v1396_v30 = vadd.f32 %v1395_v26, %v4787_v15  ;;  %2421 = vmatprep.mubr.bf16.mxu1 %v1807_v21  ;;  %2518 = vmatprep.mubr.bf16.mxu0 %v1809_v20  ;;  %v1727_v40 = vmax.f32 %v1281_v24, 0.0 }
 0x266   : > { %v1284_v33 = vpop.f32.mrf.mxu1  ;;  %v1397_v34 = vpop.f32.mrf.mxu0  ;;  %2422 = vmatmul.mubr.bf16.gmra.mxu1 %v1806_v22  ;;  %2519 = vmatmul.mubr.bf16.gmra.mxu0 %v1808_v23  ;;  %v1729_v41 = vmax.f32 %v1394_v27, 0.0  ;;  %v856_v23 = vsub.s32 5, %v4765_v3 }
 0x267   : > { %v1285_v35 = vadd.f32 %v1284_v33, %v4776_v11  ;;  %v1398_v36 = vadd.f32 %v1397_v34, %v4779_v13  ;;  %v1734_v37 = vmax.f32 %v1283_v29, 0.0  ;;  %v1736_v38 = vmax.f32 %v1396_v30, 0.0 }
 0x268   : > { %v1288_v39 = vpop.f32.mrf.mxu1  ;;  %v1401_v12 = vpop.f32.mrf.mxu0  ;;  %v864_v30 = vsub.s32 7, %v4765_v3 }
 0x269   : > { %v1735_v42 = vmax.f32 %v1285_v35, 0.0  ;;  %v1737_v43 = vmax.f32 %v1398_v36, 0.0  ;;  %v1814_v50 = vpack.c.bf16 %v1734_v37, %v1726_v44  ;;  %v1816_v51 = vpack.c.bf16 %v1736_v38, %v1728_v45 }
 0x26a   : > { %v1290_v28 = vpop.f32.mrf.mxu1  ;;  %v1403_v47 = vpop.f32.mrf.mxu0  ;;  %v1289_v58 = vadd.f32 %v1288_v39, %v4784_v14  ;;  %v1402_v59 = vadd.f32 %v1401_v12, %v4787_v15  ;;  %v852_v38 = vsub.s32 4, %v4765_v3  ;;  %v860_v39 = vsub.s32 6, %v4765_v3 }
 0x26b   : > { %v1817_v48 = vpack.c.bf16 %v1737_v43, %v1729_v41  ;;  %v1815_v49 = vpack.c.bf16 %v1735_v42, %v1727_v40  ;;  %v1291_v52 = vadd.f32 %v1290_v28, %v4776_v11  ;;  %v1404_v55 = vadd.f32 %v1403_v47, %v4779_v13 }
 0x26c   : > { %v1292_v54 = vpop.f32.mrf.mxu1  ;;  %v1405_v53 = vpop.f32.mrf.mxu0  ;;  %v1742_v16 = vmax.f32 %v1289_v58, 0.0  ;;  %v1744_v17 = vmax.f32 %v1402_v59, 0.0 }
 0x26d   : > { %v1293_v56 = vadd.f32 %v1292_v54, %v4784_v14  ;;  %v1406_v57 = vadd.f32 %v1405_v53, %v4787_v15  ;;  %2429 = vmatprep.mubr.bf16.mxu1 %v1815_v49  ;;  %2526 = vmatprep.mubr.bf16.mxu0 %v1817_v48  ;;  %v1743_v5 = vmax.f32 %v1291_v52, 0.0  ;;  %v1745_v7 = vmax.f32 %v1404_v55, 0.0 }
 0x26e   : > { %v1294_v60 = vpop.f32.mrf.mxu1  ;;  %v1407_v61 = vpop.f32.mrf.mxu0  ;;  %2430 = vmatmul.mubr.bf16.gmra.mxu1 %v1814_v50  ;;  %2527 = vmatmul.mubr.bf16.gmra.mxu0 %v1816_v51 }
 0x26f   : > { %v1295_v18 = vadd.f32 %v1294_v60, %v4776_v11  ;;  %v1408_v62 = vadd.f32 %v1407_v61, %v4779_v13  ;;  %v1750_v63 = vmax.f32 %v1293_v56, 0.0  ;;  %v1752_v1 = vmax.f32 %v1406_v57, 0.0 }
 0x270   : > { %v1298_v2 = vpop.f32.mrf.mxu1  ;;  %v1411_v46 = vpop.f32.mrf.mxu0 }
 0x271   : > { %v1751_v9 = vmax.f32 %v1295_v18, 0.0  ;;  %v1753_v10 = vmax.f32 %v1408_v62, 0.0  ;;  %v1822_v24 = vpack.c.bf16 %v1750_v63, %v1742_v16  ;;  %v1824_v25 = vpack.c.bf16 %v1752_v1, %v1744_v17 }
 0x272   : > { %v1300_v19 = vpop.f32.mrf.mxu1  ;;  %v1413_v20 = vpop.f32.mrf.mxu0  ;;  %v1299_v34 = vadd.f32 %v1298_v2, %v4784_v14  ;;  %v1412_v35 = vadd.f32 %v1411_v46, %v4787_v15 }
 0x273   : > { %v1825_v21 = vpack.c.bf16 %v1753_v10, %v1745_v7  ;;  %v1823_v22 = vpack.c.bf16 %v1751_v9, %v1743_v5  ;;  %v1301_v26 = vadd.f32 %v1300_v19, %v4776_v11  ;;  %v1414_v31 = vadd.f32 %v1413_v20, %v4779_v13 }
 0x274   : > { %v1302_v27 = vpop.f32.mrf.mxu1  ;;  %v1415_v29 = vpop.f32.mrf.mxu0  ;;  %v1758_v49 = vmax.f32 %v1299_v34, 0.0  ;;  %v1760_v50 = vmax.f32 %v1412_v35, 0.0 }
 0x275   : > { %v1303_v32 = vadd.f32 %v1302_v27, %v4784_v14  ;;  %v1416_v33 = vadd.f32 %v1415_v29, %v4787_v15  ;;  %2437 = vmatprep.mubr.bf16.mxu1 %v1823_v22  ;;  %2534 = vmatprep.mubr.bf16.mxu0 %v1825_v21  ;;  %v4858_v14 = vrot.slane %v4771_v8, %v856_v23  ;;  %v1759_v45 = vmax.f32 %v1301_v26, 0.0 }
 0x276   : > { %v1304_v36 = vpop.f32.mrf.mxu1  ;;  %v1417_v37 = vpop.f32.mrf.mxu0  ;;  %2438 = vmatmul.mubr.bf16.gmra.mxu1 %v1822_v24  ;;  %2535 = vmatmul.mubr.bf16.gmra.mxu0 %v1824_v25  ;;  %v4861_v15 = vrot.slane %v4771_v8, %v864_v30  ;;  %v1761_v28 = vmax.f32 %v1414_v31, 0.0 }
 0x277   : > { %v1305_v12 = vadd.f32 %v1304_v36, %v4776_v11  ;;  %v1418_v40 = vadd.f32 %v1417_v37, %v4779_v13  ;;  %v1766_v41 = vmax.f32 %v1303_v32, 0.0  ;;  %v1768_v42 = vmax.f32 %v1416_v33, 0.0 }
 0x278   : > { %v1454_v43 = vpop.f32.mrf.mxu1  ;;  %v1567_v44 = vpop.f32.mrf.mxu0  ;;  %v4864_v11 = vrot.slane %v4771_v8, %v852_v38  ;;  %v4867_v13 = vrot.slane %v4771_v8, %v860_v39 }
 0x279   : > { %v1767_v47 = vmax.f32 %v1305_v12, 0.0  ;;  %v1769_v48 = vmax.f32 %v1418_v40, 0.0  ;;  %v1830_v55 = vpack.c.bf16 %v1766_v41, %v1758_v49  ;;  %v1832_v56 = vpack.c.bf16 %v1768_v42, %v1760_v50 }
 0x27a   : > { %v1456_v51 = vpop.f32.mrf.mxu1  ;;  %v1569_v52 = vpop.f32.mrf.mxu0  ;;  %v1455_v8 = vadd.f32 %v1454_v43, %v4864_v11  ;;  %v1568_v62 = vadd.f32 %v1567_v44, %v4867_v13 }
 0x27b   : > { %v1833_v54 = vpack.c.bf16 %v1769_v48, %v1761_v28  ;;  %v1831_v53 = vpack.c.bf16 %v1767_v47, %v1759_v45  ;;  %v1457_v57 = vadd.f32 %v1456_v51, %v4858_v14  ;;  %v1570_v60 = vadd.f32 %v1569_v52, %v4861_v15 }
 0x27c   : > { %v1458_v58 = vpop.f32.mrf.mxu1  ;;  %v1571_v59 = vpop.f32.mrf.mxu0  ;;  %v1650_v21 = vmax.f32 %v1455_v8, 0.0  ;;  %v1652_v22 = vmax.f32 %v1568_v62, 0.0 }
 0x27d   : > { %v1459_v61 = vadd.f32 %v1458_v58, %v4864_v11  ;;  %v1572_v18 = vadd.f32 %v1571_v59, %v4867_v13  ;;  %2445 = vmatprep.mubr.bf16.mxu1 %v1831_v53  ;;  %2542 = vmatprep.mubr.bf16.mxu0 %v1833_v54  ;;  %v1651_v16 = vmax.f32 %v1457_v57, 0.0  ;;  %v1653_v17 = vmax.f32 %v1570_v60, 0.0 }
 0x27e   : > { %v1460_v63 = vpop.f32.mrf.mxu1  ;;  %v1573_v1 = vpop.f32.mrf.mxu0  ;;  %2446 = vmatmul.mubr.bf16.gmra.mxu1 %v1830_v55  ;;  %2543 = vmatmul.mubr.bf16.gmra.mxu0 %v1832_v56 }
 0x27f   : > { %v1461_v2 = vadd.f32 %v1460_v63, %v4858_v14  ;;  %v1574_v46 = vadd.f32 %v1573_v1, %v4861_v15  ;;  %v1658_v5 = vmax.f32 %v1459_v61, 0.0  ;;  %v1660_v7 = vmax.f32 %v1572_v18, 0.0 }
 0x280   : > { %v1464_v9 = vpop.f32.mrf.mxu1  ;;  %v1577_v10 = vpop.f32.mrf.mxu0 }
 0x281   : > { %v1659_v19 = vmax.f32 %v1461_v2, 0.0  ;;  %v1661_v20 = vmax.f32 %v1574_v46, 0.0  ;;  %v1778_v27 = vpack.c.bf16 %v1658_v5, %v1650_v21  ;;  %v1780_v29 = vpack.c.bf16 %v1660_v7, %v1652_v22 }
 0x282   : > { %v1466_v23 = vpop.f32.mrf.mxu1  ;;  %v1579_v24 = vpop.f32.mrf.mxu0  ;;  %v1465_v36 = vadd.f32 %v1464_v9, %v4864_v11  ;;  %v1578_v37 = vadd.f32 %v1577_v10, %v4867_v13 }
 0x283   : > { %v1781_v25 = vpack.c.bf16 %v1661_v20, %v1653_v17  ;;  %v1779_v26 = vpack.c.bf16 %v1659_v19, %v1651_v16  ;;  %v1467_v30 = vadd.f32 %v1466_v23, %v4858_v14  ;;  %v1580_v33 = vadd.f32 %v1579_v24, %v4861_v15 }
 0x284   : > { %v1468_v31 = vpop.f32.mrf.mxu1  ;;  %v1581_v32 = vpop.f32.mrf.mxu0  ;;  %v1666_v49 = vmax.f32 %v1465_v36, 0.0  ;;  %v1668_v50 = vmax.f32 %v1578_v37, 0.0 }
 0x285   : > { %v1469_v34 = vadd.f32 %v1468_v31, %v4864_v11  ;;  %v1582_v35 = vadd.f32 %v1581_v32, %v4867_v13  ;;  %2583 = vmatprep.mubr.bf16.mxu1 %v1779_v26  ;;  %2680 = vmatprep.mubr.bf16.mxu0 %v1781_v25  ;;  %v1667_v45 = vmax.f32 %v1467_v30, 0.0  ;;  %v1669_v28 = vmax.f32 %v1580_v33, 0.0 }
 0x286   : > { %v1470_v38 = vpop.f32.mrf.mxu1  ;;  %v1583_v39 = vpop.f32.mrf.mxu0  ;;  %2584 = vmatmul.mubr.bf16.vlgmr.msra.gmra.mxu1 %v1778_v27  ;;  %2681 = vmatmul.mubr.bf16.vlgmr.msra.gmra.mxu0 %v1780_v29 }
 0x287   : > { %v1471_v12 = vadd.f32 %v1470_v38, %v4858_v14  ;;  %v1584_v40 = vadd.f32 %v1583_v39, %v4861_v15  ;;  %v1674_v41 = vmax.f32 %v1469_v34, 0.0  ;;  %v1676_v42 = vmax.f32 %v1582_v35, 0.0 }
 0x288   : > { %v1474_v43 = vpop.f32.mrf.mxu1  ;;  %v1587_v44 = vpop.f32.mrf.mxu0 }
 0x289   : > { %v1675_v47 = vmax.f32 %v1471_v12, 0.0  ;;  %v1677_v48 = vmax.f32 %v1584_v40, 0.0  ;;  %v1786_v55 = vpack.c.bf16 %v1674_v41, %v1666_v49  ;;  %v1788_v56 = vpack.c.bf16 %v1676_v42, %v1668_v50  ;;  %v4082_v49 = vld [vmem:[#allocation11 + $0x70] ss:$8 sps:$4 sm:$0xff]   ;;  %v4084_v50 = vld [vmem:[#allocation11 + $0x74] ss:$8 sps:$4 sm:$0xff]  }
 0x28a   : > { %v1476_v51 = vpop.f32.mrf.mxu1  ;;  %v1589_v52 = vpop.f32.mrf.mxu0  ;;  %v1475_v8 = vadd.f32 %v1474_v43, %v4864_v11  ;;  %v1588_v62 = vadd.f32 %v1587_v44, %v4867_v13  ;;  %2877 = vmatprep.subr.bf16.mxu1 %v4084_v50 }
 0x28b   : > { %v1789_v54 = vpack.c.bf16 %v1677_v48, %v1669_v28  ;;  %v1787_v53 = vpack.c.bf16 %v1675_v47, %v1667_v45  ;;  %v1477_v57 = vadd.f32 %v1476_v51, %v4858_v14  ;;  %v1590_v60 = vadd.f32 %v1589_v52, %v4861_v15  ;;  %2878 = vmatpush1.bf16.msra.mxu1 %v4082_v49 }
 0x28c   : > { %v1478_v58 = vpop.f32.mrf.mxu1  ;;  %v1591_v59 = vpop.f32.mrf.mxu0  ;;  %v1682_v21 = vmax.f32 %v1475_v8, 0.0  ;;  %v1684_v22 = vmax.f32 %v1588_v62, 0.0 }
 0x28d   : > { %v1479_v61 = vadd.f32 %v1478_v58, %v4864_v11  ;;  %v1592_v18 = vadd.f32 %v1591_v59, %v4867_v13  ;;  %2591 = vmatprep.mubr.bf16.mxu1 %v1787_v53  ;;  %2688 = vmatprep.mubr.bf16.mxu0 %v1789_v54  ;;  %v1683_v16 = vmax.f32 %v1477_v57, 0.0  ;;  %v1685_v17 = vmax.f32 %v1590_v60, 0.0 }
 0x28e   : > { %v1480_v63 = vpop.f32.mrf.mxu1  ;;  %v1593_v1 = vpop.f32.mrf.mxu0  ;;  %2592 = vmatmul.mubr.bf16.gmra.mxu1 %v1786_v55  ;;  %2689 = vmatmul.mubr.bf16.gmra.mxu0 %v1788_v56 }
 0x28f   : > { %v1481_v2 = vadd.f32 %v1480_v63, %v4858_v14  ;;  %v1594_v46 = vadd.f32 %v1593_v1, %v4861_v15  ;;  %v1690_v5 = vmax.f32 %v1479_v61, 0.0  ;;  %v1692_v7 = vmax.f32 %v1592_v18, 0.0 }
 0x290   : > { %v1484_v9 = vpop.f32.mrf.mxu1  ;;  %v1597_v10 = vpop.f32.mrf.mxu0 }
 0x291   : > { %v1691_v19 = vmax.f32 %v1481_v2, 0.0  ;;  %v1693_v20 = vmax.f32 %v1594_v46, 0.0  ;;  %v1794_v27 = vpack.c.bf16 %v1690_v5, %v1682_v21  ;;  %v1796_v29 = vpack.c.bf16 %v1692_v7, %v1684_v22 }
 0x292   : > { %v1486_v23 = vpop.f32.mrf.mxu1  ;;  %v1599_v24 = vpop.f32.mrf.mxu0  ;;  %v1485_v36 = vadd.f32 %v1484_v9, %v4864_v11  ;;  %v1598_v37 = vadd.f32 %v1597_v10, %v4867_v13 }
 0x293   : > { %v1797_v25 = vpack.c.bf16 %v1693_v20, %v1685_v17  ;;  %v1795_v26 = vpack.c.bf16 %v1691_v19, %v1683_v16  ;;  %v1487_v30 = vadd.f32 %v1486_v23, %v4858_v14  ;;  %v1600_v31 = vadd.f32 %v1599_v24, %v4861_v15  ;;  %v4085_v23 = vld [vmem:[#allocation11 + $0x60] ss:$8 sps:$4 sm:$0xff]   ;;  %v4087_v24 = vld [vmem:[#allocation11 + $0x64] ss:$8 sps:$4 sm:$0xff]  }
 0x294   : > { %v1488_v32 = vpop.f32.mrf.mxu1  ;;  %v1601_v33 = vpop.f32.mrf.mxu0  ;;  %v1698_v51 = vmax.f32 %v1485_v36, 0.0  ;;  %v1700_v52 = vmax.f32 %v1598_v37, 0.0  ;;  %2879 = vmatprep.subr.bf16.mxu1 %v4087_v24 }
 0x295   : > { %v1489_v34 = vadd.f32 %v1488_v32, %v4864_v11  ;;  %v1602_v35 = vadd.f32 %v1601_v33, %v4867_v13  ;;  %2599 = vmatprep.mubr.bf16.mxu1 %v1795_v26  ;;  %2696 = vmatprep.mubr.bf16.mxu0 %v1797_v25  ;;  %v1699_v41 = vmax.f32 %v1487_v30, 0.0  ;;  %v1701_v42 = vmax.f32 %v1600_v31, 0.0 }
 0x296   : > { %v1490_v38 = vpop.f32.mrf.mxu1  ;;  %v1603_v39 = vpop.f32.mrf.mxu0  ;;  %2600 = vmatmul.mubr.bf16.gmra.mxu1 %v1794_v27  ;;  %2697 = vmatmul.mubr.bf16.gmra.mxu0 %v1796_v29 }
 0x297   : > { %v1491_v12 = vadd.f32 %v1490_v38, %v4858_v14  ;;  %v1604_v40 = vadd.f32 %v1603_v39, %v4861_v15  ;;  %v1706_v43 = vmax.f32 %v1489_v34, 0.0  ;;  %v1708_v44 = vmax.f32 %v1602_v35, 0.0  ;;  %2880 = vmatpush1.bf16.msra.mxu1 %v4085_v23 }
 0x298   : > { %v1494_v45 = vpop.f32.mrf.mxu1  ;;  %v1607_v28 = vpop.f32.mrf.mxu0 }
 0x299   : > { %v1707_v47 = vmax.f32 %v1491_v12, 0.0  ;;  %v1709_v48 = vmax.f32 %v1604_v40, 0.0  ;;  %v1802_v57 = vpack.c.bf16 %v1706_v43, %v1698_v51  ;;  %v1804_v58 = vpack.c.bf16 %v1708_v44, %v1700_v52 }
 0x29a   : > { %v1496_v54 = vpop.f32.mrf.mxu1  ;;  %v1609_v53 = vpop.f32.mrf.mxu0  ;;  %v1495_v63 = vadd.f32 %v1494_v45, %v4864_v11  ;;  %v1608_v1 = vadd.f32 %v1607_v28, %v4867_v13 }
 0x29b   : > { %v1805_v55 = vpack.c.bf16 %v1709_v48, %v1701_v42  ;;  %v1803_v56 = vpack.c.bf16 %v1707_v47, %v1699_v41  ;;  %v1497_v59 = vadd.f32 %v1496_v54, %v4858_v14  ;;  %v1610_v60 = vadd.f32 %v1609_v53, %v4861_v15  ;;  %v4088_v54 = vld [vmem:[#allocation11 + $0x50] ss:$8 sps:$4 sm:$0xff]   ;;  %v4090_v53 = vld [vmem:[#allocation11 + $0x54] ss:$8 sps:$4 sm:$0xff]  }
 0x29c   : > { %v1498_v61 = vpop.f32.mrf.mxu1  ;;  %v1611_v18 = vpop.f32.mrf.mxu0  ;;  %v1714_v25 = vmax.f32 %v1495_v63, 0.0  ;;  %v1716_v26 = vmax.f32 %v1608_v1, 0.0  ;;  %2881 = vmatprep.subr.bf16.mxu1 %v4090_v53 }
 0x29d   : > { %v1499_v8 = vadd.f32 %v1498_v61, %v4864_v11  ;;  %v1612_v62 = vadd.f32 %v1611_v18, %v4867_v13  ;;  %2607 = vmatprep.mubr.bf16.mxu1 %v1803_v56  ;;  %2704 = vmatprep.mubr.bf16.mxu0 %v1805_v55  ;;  %v1715_v9 = vmax.f32 %v1497_v59, 0.0  ;;  %v1717_v10 = vmax.f32 %v1610_v60, 0.0 }
 0x29e   : > { %v1500_v2 = vpop.f32.mrf.mxu1  ;;  %v1613_v46 = vpop.f32.mrf.mxu0  ;;  %2608 = vmatmul.mubr.bf16.gmra.mxu1 %v1802_v57  ;;  %2705 = vmatmul.mubr.bf16.gmra.mxu0 %v1804_v58 }
 0x29f   : > { %v1501_v5 = vadd.f32 %v1500_v2, %v4858_v14  ;;  %v1614_v7 = vadd.f32 %v1613_v46, %v4861_v15  ;;  %v1722_v16 = vmax.f32 %v1499_v8, 0.0  ;;  %v1724_v17 = vmax.f32 %v1612_v62, 0.0  ;;  %2882 = vmatpush1.bf16.msra.mxu1 %v4088_v54 }
 0x2a0   : > { %v1504_v19 = vpop.f32.mrf.mxu1  ;;  %v1617_v20 = vpop.f32.mrf.mxu0 }
 0x2a1   : > { %v1723_v21 = vmax.f32 %v1501_v5, 0.0  ;;  %v1725_v22 = vmax.f32 %v1614_v7, 0.0  ;;  %v1810_v32 = vpack.c.bf16 %v1722_v16, %v1714_v25  ;;  %v1812_v33 = vpack.c.bf16 %v1724_v17, %v1716_v26 }
 0x2a2   : > { %v1506_v27 = vpop.f32.mrf.mxu1  ;;  %v1619_v29 = vpop.f32.mrf.mxu0  ;;  %v1505_v12 = vadd.f32 %v1504_v19, %v4864_v11  ;;  %v1618_v40 = vadd.f32 %v1617_v20, %v4867_v13 }
 0x2a3   : > { %v1811_v30 = vpack.c.bf16 %v1723_v21, %v1715_v9  ;;  %v1813_v31 = vpack.c.bf16 %v1725_v22, %v1717_v10  ;;  %v1507_v34 = vadd.f32 %v1506_v27, %v4858_v14  ;;  %v1620_v35 = vadd.f32 %v1619_v29, %v4861_v15  ;;  %v4091_v27 = vld [vmem:[#allocation11 + $0x40] ss:$8 sps:$4 sm:$0xff]   ;;  %v4093_v29 = vld [vmem:[#allocation11 + $0x44] ss:$8 sps:$4 sm:$0xff]  }
 0x2a4   : > { %v1508_v36 = vpop.f32.mrf.mxu1  ;;  %v1621_v37 = vpop.f32.mrf.mxu0  ;;  %v1730_v55 = vmax.f32 %v1505_v12, 0.0  ;;  %v1732_v56 = vmax.f32 %v1618_v40, 0.0  ;;  %2883 = vmatprep.subr.bf16.mxu1 %v4093_v29 }
 0x2a5   : > { %v1509_v38 = vadd.f32 %v1508_v36, %v4864_v11  ;;  %v1622_v39 = vadd.f32 %v1621_v37, %v4867_v13  ;;  %2615 = vmatprep.mubr.bf16.mxu1 %v1811_v30  ;;  %2712 = vmatprep.mubr.bf16.mxu0 %v1813_v31  ;;  %v1731_v45 = vmax.f32 %v1507_v34, 0.0  ;;  %v1733_v28 = vmax.f32 %v1620_v35, 0.0 }
 0x2a6   : > { %v1510_v41 = vpop.f32.mrf.mxu1  ;;  %v1623_v42 = vpop.f32.mrf.mxu0  ;;  %2616 = vmatmul.mubr.bf16.gmra.mxu1 %v1810_v32  ;;  %2713 = vmatmul.mubr.bf16.gmra.mxu0 %v1812_v33 }
 0x2a7   : > { %v1511_v43 = vadd.f32 %v1510_v41, %v4858_v14  ;;  %v1624_v44 = vadd.f32 %v1623_v42, %v4861_v15  ;;  %v1738_v47 = vmax.f32 %v1509_v38, 0.0  ;;  %v1740_v48 = vmax.f32 %v1622_v39, 0.0  ;;  %2884 = vmatpush1.bf16.msra.mxu1 %v4091_v27 }
 0x2a8   : > { %v1514_v49 = vpop.f32.mrf.mxu1  ;;  %v1627_v50 = vpop.f32.mrf.mxu0 }
 0x2a9   : > { %v1739_v51 = vmax.f32 %v1511_v43, 0.0  ;;  %v1741_v52 = vmax.f32 %v1624_v44, 0.0  ;;  %v1818_v61 = vpack.c.bf16 %v1738_v47, %v1730_v55  ;;  %v1820_v18 = vpack.c.bf16 %v1740_v48, %v1732_v56  ;;  %v4094_v55 = vld [vmem:[#allocation11 + $0x30] ss:$8 sps:$4 sm:$0xff]   ;;  %v4096_v56 = vld [vmem:[#allocation11 + $0x34] ss:$8 sps:$4 sm:$0xff]  }
 0x2aa   : > { %v1516_v57 = vpop.f32.mrf.mxu1  ;;  %v1629_v58 = vpop.f32.mrf.mxu0  ;;  %v1515_v5 = vadd.f32 %v1514_v49, %v4864_v11  ;;  %v1628_v7 = vadd.f32 %v1627_v50, %v4867_v13  ;;  %2885 = vmatprep.subr.bf16.mxu1 %v4096_v56 }
 0x2ab   : > { %v1819_v59 = vpack.c.bf16 %v1739_v51, %v1731_v45  ;;  %v1821_v60 = vpack.c.bf16 %v1741_v52, %v1733_v28  ;;  %v1517_v8 = vadd.f32 %v1516_v57, %v4858_v14  ;;  %v1630_v62 = vadd.f32 %v1629_v58, %v4861_v15  ;;  %2886 = vmatpush1.bf16.msra.mxu1 %v4094_v55 }
 0x2ac   : > { %v1518_v63 = vpop.f32.mrf.mxu1  ;;  %v1631_v1 = vpop.f32.mrf.mxu0  ;;  %v1746_v30 = vmax.f32 %v1515_v5, 0.0  ;;  %v1748_v31 = vmax.f32 %v1628_v7, 0.0 }
 0x2ad   : > { %v1519_v2 = vadd.f32 %v1518_v63, %v4864_v11  ;;  %v1632_v46 = vadd.f32 %v1631_v1, %v4867_v13  ;;  %2623 = vmatprep.mubr.bf16.mxu1 %v1819_v59  ;;  %2720 = vmatprep.mubr.bf16.mxu0 %v1821_v60  ;;  %v1747_v19 = vmax.f32 %v1517_v8, 0.0  ;;  %v1749_v20 = vmax.f32 %v1630_v62, 0.0  ;;  %v4105_v8 = vld [vmem:[#allocation11 + $0x4] ss:$8 sps:$4 sm:$0xff]   ;;  %v4103_v62 = vld [vmem:[#allocation11] ss:$8 sps:$4 sm:$0xff]  }
 0x2ae   : > { %v1520_v9 = vpop.f32.mrf.mxu1  ;;  %v1633_v10 = vpop.f32.mrf.mxu0  ;;  %2624 = vmatmul.mubr.bf16.gmra.mxu1 %v1818_v61  ;;  %2721 = vmatmul.mubr.bf16.gmra.mxu0 %v1820_v18  ;;  %v4100_v61 = vld [vmem:[#allocation11 + $0x10] ss:$8 sps:$4 sm:$0xff]   ;;  %v4102_v18 = vld [vmem:[#allocation11 + $0x14] ss:$8 sps:$4 sm:$0xff]  }
 0x2af   : > { %v1521_v16 = vadd.f32 %v1520_v9, %v4858_v14  ;;  %v1634_v17 = vadd.f32 %v1633_v10, %v4861_v15  ;;  %v1754_v21 = vmax.f32 %v1519_v2, 0.0  ;;  %v1756_v22 = vmax.f32 %v1632_v46, 0.0  ;;  %v4937_v2 = vld [vmem:[%s5319_s6] ss:$0 sm:$0xff] }
 0x2b0   : > { %v1524_v23 = vpop.f32.mrf.mxu1  ;;  %v1637_v24 = vpop.f32.mrf.mxu0 }
 0x2b1   : > { %v1755_v25 = vmax.f32 %v1521_v16, 0.0  ;;  %v1757_v26 = vmax.f32 %v1634_v17, 0.0  ;;  %v1826_v36 = vpack.c.bf16 %v1754_v21, %v1746_v30  ;;  %v1828_v37 = vpack.c.bf16 %v1756_v22, %v1748_v31 }
 0x2b2   : > { %v1526_v32 = vpop.f32.mrf.mxu1  ;;  %v1639_v33 = vpop.f32.mrf.mxu0  ;;  %v1525_v43 = vadd.f32 %v1524_v23, %v4864_v11  ;;  %v1638_v44 = vadd.f32 %v1637_v24, %v4867_v13 }
 0x2b3   : > { %v1827_v34 = vpack.c.bf16 %v1755_v25, %v1747_v19  ;;  %v1829_v35 = vpack.c.bf16 %v1757_v26, %v1749_v20  ;;  %v1527_v38 = vadd.f32 %v1526_v32, %v4858_v14  ;;  %v1640_v39 = vadd.f32 %v1639_v33, %v4861_v15 }
 0x2b4   : > { %v1528_v12 = vpop.f32.mrf.mxu1  ;;  %v1641_v40 = vpop.f32.mrf.mxu0  ;;  %v1762_v57 = vmax.f32 %v1525_v43, 0.0 }
 0x2b5   : > { %v1529_v41 = vadd.f32 %v1528_v12, %v4864_v11  ;;  %v1642_v42 = vadd.f32 %v1641_v40, %v4867_v13  ;;  %2631 = vmatprep.mubr.bf16.mxu1 %v1827_v34  ;;  %2728 = vmatprep.mubr.bf16.mxu0 %v1829_v35  ;;  %v1763_v49 = vmax.f32 %v1527_v38, 0.0  ;;  %v1765_v50 = vmax.f32 %v1640_v39, 0.0 }
 0x2b6   : > { %v1530_v45 = vpop.f32.mrf.mxu1  ;;  %v1643_v28 = vpop.f32.mrf.mxu0  ;;  %2632 = vmatmul.mubr.bf16.gmra.mxu1 %v1826_v36  ;;  %2729 = vmatmul.mubr.bf16.gmra.mxu0 %v1828_v37  ;;  %v1764_v11 = vmax.f32 %v1638_v44, 0.0 }
 0x2b7   : > { %v1531_v47 = vadd.f32 %v1530_v45, %v4858_v14  ;;  %v1644_v48 = vadd.f32 %v1643_v28, %v4861_v15  ;;  %v1770_v51 = vmax.f32 %v1529_v41, 0.0  ;;  %v1772_v52 = vmax.f32 %v1642_v42, 0.0  ;;  %v4097_v14 = vld [vmem:[#allocation11 + $0x20] ss:$8 sps:$4 sm:$0xff]   ;;  %v4099_v15 = vld [vmem:[#allocation11 + $0x24] ss:$8 sps:$4 sm:$0xff]  }
 0x2b8   : > { %2887 = vmatprep.subr.bf16.mxu1 %v4099_v15 }
 0x2b9   : > { %v1771_v54 = vmax.f32 %v1531_v47, 0.0  ;;  %v1773_v53 = vmax.f32 %v1644_v48, 0.0  ;;  %v1834_v59 = vpack.c.bf16 %v1770_v51, %v1762_v57  ;;  %v1836_v60 = vpack.c.bf16 %v1772_v52, %v1764_v11  ;;  %2888 = vmatpush1.bf16.msra.mxu1 %v4097_v14 }
 0x2ba   : > { %2889 = vmatprep.subr.bf16.mxu1 %v4102_v18 }
 0x2bb   : > { %v1835_v58 = vpack.c.bf16 %v1771_v54, %v1763_v49  ;;  %v1837_v13 = vpack.c.bf16 %v1773_v53, %v1765_v50 }
 0x2bd   : > { %2639 = vmatprep.mubr.bf16.mxu1 %v1835_v58  ;;  %2736 = vmatprep.mubr.bf16.mxu0 %v1837_v13 }
 0x2be   : > { %2640 = vmatmul.mubr.bf16.gmra.mxu1 %v1834_v59  ;;  %2737 = vmatmul.mubr.bf16.gmra.mxu0 %v1836_v60 }
 0x2bf   : > { %2909 = vmatprep.mubr.bf16.mxu1 %v4388_v0  ;;  %2890 = vmatpush1.bf16.msra.mxu1 %v4100_v61 }
 0x2c0   : > { %2891 = vmatprep.subr.bf16.mxu1 %v4105_v8 }
 0x2c3   : > { %2892 = vmatpush1.bf16.msra.mxu1 %v4103_v62 }
 0x306   : > { %v3652_v63 = vpop.f32.mrf.mxu1  ;;  %v3716_v1 = vpop.f32.mrf.mxu0 }
 0x308   : > { %v3653_v46 = vpop.f32.mrf.mxu1  ;;  %v3717_v5 = vpop.f32.mrf.mxu0 }
 0x309   : > { %v3654_v7 = vadd.f32 %v3653_v46, %v3652_v63  ;;  %v3718_v9 = vadd.f32 %v3717_v5, %v3716_v1 }
 0x30a   : > { %v4939_v10 = vpop.f32.mrf.mxu1  ;;  %v4941_v16 = vpop.f32.mrf.mxu0 }
 0x30b   : > { %v2392_v17 = vadd.f32 %v3654_v7, %v4937_v2 }
 0x30c   : > { %v4944_v19 = vpop.f32.mrf.mxu1  ;;  %v4946_v20 = vpop.f32.mrf.mxu0 }
 0x30d   : > { %v4948_v21 = vadd.f32 %v3718_v9, %v2392_v17 }
 0x30e   : > { %v3658_v22 = vpop.f32.mrf.mxu1  ;;  %v3722_v23 = vpop.f32.mrf.mxu0 }
 0x310   : > { %v3659_v24 = vpop.f32.mrf.mxu1  ;;  %v3723_v25 = vpop.f32.mrf.mxu0 }
 0x311   : > { %v3660_v26 = vadd.f32 %v3659_v24, %v3658_v22  ;;  %v3724_v27 = vadd.f32 %v3723_v25, %v3722_v23 }
 0x312   : > { %v4950_v29 = vpop.f32.mrf.mxu1  ;;  %v4952_v30 = vpop.f32.mrf.mxu0 }
 0x313   : > { %v2400_v31 = vadd.f32 %v3660_v26, %v4937_v2 }
 0x314   : > { %v4955_v32 = vpop.f32.mrf.mxu1  ;;  %v4957_v33 = vpop.f32.mrf.mxu0 }
 0x315   : > { %v4959_v34 = vadd.f32 %v3724_v27, %v2400_v31 }
 0x316   : > { %v3664_v35 = vpop.f32.mrf.mxu1  ;;  %v3728_v36 = vpop.f32.mrf.mxu0 }
 0x318   : > { %v3665_v37 = vpop.f32.mrf.mxu1  ;;  %v3729_v38 = vpop.f32.mrf.mxu0 }
 0x319   : > { %v3666_v39 = vadd.f32 %v3665_v37, %v3664_v35  ;;  %v3730_v12 = vadd.f32 %v3729_v38, %v3728_v36 }
 0x31a   : > { %v4961_v40 = vpop.f32.mrf.mxu1  ;;  %v4963_v41 = vpop.f32.mrf.mxu0 }
 0x31b   : > { %v2408_v42 = vadd.f32 %v3666_v39, %v4937_v2 }
 0x31c   : > { %v4966_v43 = vpop.f32.mrf.mxu1  ;;  %v4968_v44 = vpop.f32.mrf.mxu0 }
 0x31d   : > { %v4970_v45 = vadd.f32 %v3730_v12, %v2408_v42 }
 0x31e   : > { %v3670_v28 = vpop.f32.mrf.mxu1  ;;  %v3734_v47 = vpop.f32.mrf.mxu0 }
 0x320   : > { %v3671_v48 = vpop.f32.mrf.mxu1  ;;  %v3735_v49 = vpop.f32.mrf.mxu0 }
 0x321   : > { %v3672_v50 = vadd.f32 %v3671_v48, %v3670_v28  ;;  %v3736_v51 = vadd.f32 %v3735_v49, %v3734_v47 }
 0x322   : > { %v4972_v52 = vpop.f32.mrf.mxu1  ;;  %v4974_v54 = vpop.f32.mrf.mxu0 }
 0x323   : > { %v2416_v53 = vadd.f32 %v3672_v50, %v4937_v2 }
 0x324   : > { %v4977_v55 = vpop.f32.mrf.mxu1  ;;  %v4979_v56 = vpop.f32.mrf.mxu0 }
 0x325   : > { %v4981_v57 = vadd.f32 %v3736_v51, %v2416_v53 }
 0x326   : > { %v3676_v11 = vpop.f32.mrf.mxu1  ;;  %v3740_v58 = vpop.f32.mrf.mxu0 }
 0x328   : > { %v3677_v13 = vpop.f32.mrf.mxu1  ;;  %v3741_v59 = vpop.f32.mrf.mxu0 }
 0x329   : > { %v3678_v60 = vadd.f32 %v3677_v13, %v3676_v11  ;;  %v3742_v14 = vadd.f32 %v3741_v59, %v3740_v58 }
 0x32a   : > { %v4983_v15 = vpop.f32.mrf.mxu1  ;;  %v4985_v61 = vpop.f32.mrf.mxu0 }
 0x32b   : > { %v2424_v18 = vadd.f32 %v3678_v60, %v4937_v2 }
 0x32c   : > { %v4988_v8 = vpop.f32.mrf.mxu1  ;;  %v4990_v62 = vpop.f32.mrf.mxu0 }
 0x32d   : > { %v4992_v63 = vadd.f32 %v3742_v14, %v2424_v18 }
 0x32e   : > { %v3682_v1 = vpop.f32.mrf.mxu1  ;;  %v3746_v46 = vpop.f32.mrf.mxu0 }
 0x330   : > { %v3683_v5 = vpop.f32.mrf.mxu1  ;;  %v3747_v7 = vpop.f32.mrf.mxu0 }
 0x331   : > { %v3684_v9 = vadd.f32 %v3683_v5, %v3682_v1  ;;  %v3748_v17 = vadd.f32 %v3747_v7, %v3746_v46  ;;  %v3657_v46 = vadd.f32 %v4944_v19, %v4939_v10  ;;  %v3663_v10 = vadd.f32 %v4955_v32, %v4950_v29 }
 0x332   : > { %v4994_v22 = vpop.f32.mrf.mxu1  ;;  %v4996_v23 = vpop.f32.mrf.mxu0 }
 0x333   : > { %v2432_v24 = vadd.f32 %v3684_v9, %v4937_v2  ;;  %v2403_v4 = vadd.f32 %v3663_v10, %v4937_v2 }
 0x334   : > { %v4999_v25 = vpop.f32.mrf.mxu1  ;;  %v5001_v26 = vpop.f32.mrf.mxu0 }
 0x335   : > { %v5003_v27 = vadd.f32 %v3748_v17, %v2432_v24 }
 0x336   : > { %v3688_v31 = vpop.f32.mrf.mxu1  ;;  %v3752_v35 = vpop.f32.mrf.mxu0 }
 0x338   : > { %v3689_v36 = vpop.f32.mrf.mxu1  ;;  %v3753_v37 = vpop.f32.mrf.mxu0 }
 0x339   : > { %v3690_v38 = vadd.f32 %v3689_v36, %v3688_v31  ;;  %v3754_v39 = vadd.f32 %v3753_v37, %v3752_v35  ;;  %v2395_v31 = vadd.f32 %v3657_v46, %v4937_v2 }
 0x33a   : > { %v5005_v12 = vpop.f32.mrf.mxu1  ;;  %v5007_v42 = vpop.f32.mrf.mxu0 }
 0x33b   : > { %v2440_v28 = vadd.f32 %v3690_v38, %v4937_v2  ;;  %v3721_v38 = vadd.f32 %v4946_v20, %v4941_v16 }
 0x33c   : > { %v5010_v47 = vpop.f32.mrf.mxu1  ;;  %v5012_v48 = vpop.f32.mrf.mxu0 }
 0x33d   : > { %v5014_v49 = vadd.f32 %v3754_v39, %v2440_v28 }
 0x33e   : > { %v3694_v50 = vpop.f32.mrf.mxu1  ;;  %v3758_v51 = vpop.f32.mrf.mxu0 }
 0x340   : > { %v3695_v53 = vpop.f32.mrf.mxu1  ;;  %v3759_v11 = vpop.f32.mrf.mxu0 }
 0x341   : > { %v3696_v58 = vadd.f32 %v3695_v53, %v3694_v50  ;;  %v3760_v13 = vadd.f32 %v3759_v11, %v3758_v51  ;;  %v2492_v51 = vadd.f32 %v3721_v38, %v2395_v31  ;;  %v3727_v31 = vadd.f32 %v4957_v33, %v4952_v30 }
 0x342   : > { %v5016_v59 = vpop.f32.mrf.mxu1  ;;  %v5018_v60 = vpop.f32.mrf.mxu0 }
 0x343   : > { %v2448_v14 = vadd.f32 %v3696_v58, %v4937_v2 }
 0x344   : > { %v5021_v18 = vpop.f32.mrf.mxu1  ;;  %v5023_v1 = vpop.f32.mrf.mxu0 }
 0x345   : > { %v5027_v5 = vadd.f32 %v3760_v13, %v2448_v14 }
 0x346   : > { %v3780_v7 = vpop.f32.mrf.mxu1  ;;  %v3844_v9 = vpop.f32.mrf.mxu0 }
 0x348   : > { %v3781_v17 = vpop.f32.mrf.mxu1  ;;  %v3845_v24 = vpop.f32.mrf.mxu0 }
 0x349   : > { %v3782_v35 = vadd.f32 %v3781_v17, %v3780_v7  ;;  %v3846_v19 = vadd.f32 %v3845_v24, %v3844_v9  ;;  %v3669_v9 = vadd.f32 %v4966_v43, %v4961_v40 }
 0x34a   : > { %v3783_v36 = vpop.f32.mrf.mxu1  ;;  %v3847_v37 = vpop.f32.mrf.mxu0 }
 0x34b   : > { %v2586_v39 = vadd.f32 %v3782_v35, %v4948_v21  ;;  %v2411_v30 = vadd.f32 %v3669_v9, %v4937_v2 }
 0x34c   : > { %v3784_v28 = vpop.f32.mrf.mxu1  ;;  %v3848_v50 = vpop.f32.mrf.mxu0 }
 0x34d   : > { %v3785_v53 = vadd.f32 %v3784_v28, %v3783_v36  ;;  %v2683_v13 = vadd.f32 %v3846_v19, %v2586_v39  ;;  %v3849_v46 = vadd.f32 %v3848_v50, %v3847_v37  ;;  %v2500_v37 = vadd.f32 %v3727_v31, %v2403_v4 }
 0x34e   : > { %v3786_v11 = vpop.f32.mrf.mxu1  ;;  %v3850_v58 = vpop.f32.mrf.mxu0  ;;  %v3733_v4 = vadd.f32 %v4968_v44, %v4963_v41 }
 0x34f   : > { %v2589_v14 = vadd.f32 %v3785_v53, %v2492_v51  ;;  %v2745_v38 = vmax.f32 %v2683_v13, 0.0 }
 0x350   : > { %v3787_v7 = vpop.f32.mrf.mxu1  ;;  %v3851_v17 = vpop.f32.mrf.mxu0 }
 0x351   : > { %v2686_v16 = vadd.f32 %v3849_v46, %v2589_v14  ;;  %v3788_v20 = vadd.f32 %v3787_v7, %v3786_v11  ;;  %v3852_v28 = vadd.f32 %v3851_v17, %v3850_v58  ;;  %v2508_v17 = vadd.f32 %v3733_v4, %v2411_v30 }
 0x352   : > { %v3789_v21 = vpop.f32.mrf.mxu1  ;;  %v3853_v35 = vpop.f32.mrf.mxu0 }
 0x353   : > { %v2746_v29 = vmax.f32 %v2686_v16, 0.0  ;;  %v2594_v32 = vadd.f32 %v3788_v20, %v4959_v34 }
 0x354   : > { %v3790_v24 = vpop.f32.mrf.mxu1  ;;  %v3854_v36 = vpop.f32.mrf.mxu0 }
 0x355   : > { %v2761_v39 = vpack.c.bf16 %v2746_v29, %v2745_v38  ;;  %v3791_v50 = vadd.f32 %v3790_v24, %v3789_v21  ;;  %v2691_v19 = vadd.f32 %v3852_v28, %v2594_v32  ;;  %v3855_v11 = vadd.f32 %v3854_v36, %v3853_v35 }
 0x356   : > { %v3792_v51 = vpop.f32.mrf.mxu1  ;;  %v3856_v10 = vpop.f32.mrf.mxu0  ;;  %v3675_v21 = vadd.f32 %v4977_v55, %v4972_v52  ;;  %v3739_v52 = vadd.f32 %v4979_v56, %v4974_v54 }
 0x357   : > { %v2597_v53 = vadd.f32 %v3791_v50, %v2500_v37  ;;  %2910 = vmatmul.mubr.bf16.vlgmr.msra.gmra.mxu1 %v2761_v39  ;;  %v2747_v14 = vmax.f32 %v2691_v19, 0.0  ;;  %v3681_v19 = vadd.f32 %v4988_v8, %v4983_v15  ;;  %v3745_v8 = vadd.f32 %v4990_v62, %v4985_v61 }
 0x358   : > { %v3793_v33 = vpop.f32.mrf.mxu1  ;;  %v3857_v13 = vpop.f32.mrf.mxu0  ;;  %2919 = vmatprep.mubr.bf16.mxu1 %v4388_v0 }
 0x359   : > { %v2694_v34 = vadd.f32 %v3855_v11, %v2597_v53  ;;  %v3794_v40 = vadd.f32 %v3793_v33, %v3792_v51  ;;  %v3858_v31 = vadd.f32 %v3857_v13, %v3856_v10  ;;  %v2427_v54 = vadd.f32 %v3681_v19, %v4937_v2 }
 0x35a   : > { %v3795_v43 = vpop.f32.mrf.mxu1  ;;  %v3859_v58 = vpop.f32.mrf.mxu0 }
 0x35b   : > { %v2748_v46 = vmax.f32 %v2694_v34, 0.0  ;;  %v2602_v7 = vadd.f32 %v3794_v40, %v4970_v45  ;;  %v2419_v45 = vadd.f32 %v3675_v21, %v4937_v2 }
 0x35c   : > { %v3796_v16 = vpop.f32.mrf.mxu1  ;;  %v3860_v20 = vpop.f32.mrf.mxu0 }
 0x35d   : > { %v2762_v35 = vpack.c.bf16 %v2748_v46, %v2747_v14  ;;  %v3797_v38 = vadd.f32 %v3796_v16, %v3795_v43  ;;  %v2699_v9 = vadd.f32 %v3858_v31, %v2602_v7  ;;  %v3861_v41 = vadd.f32 %v3860_v20, %v3859_v58 }
 0x35e   : > { %v3798_v29 = vpop.f32.mrf.mxu1  ;;  %v3862_v32 = vpop.f32.mrf.mxu0  ;;  %v2516_v30 = vadd.f32 %v3739_v52, %v2419_v45 }
 0x35f   : > { %v2605_v24 = vadd.f32 %v3797_v38, %v2508_v17  ;;  %2920 = vmatmul.mubr.bf16.gmra.mxu1 %v2762_v35  ;;  %v2749_v55 = vmax.f32 %v2699_v9, 0.0  ;;  %v2524_v35 = vadd.f32 %v3745_v8, %v2427_v54 }
 0x360   : > { %v3799_v44 = vpop.f32.mrf.mxu1  ;;  %v3863_v36 = vpop.f32.mrf.mxu0  ;;  %2929 = vmatprep.mubr.bf16.mxu1 %v4388_v0 }
 0x361   : > { %v2702_v37 = vadd.f32 %v3861_v41, %v2605_v24  ;;  %v3800_v39 = vadd.f32 %v3799_v44, %v3798_v29  ;;  %v3864_v13 = vadd.f32 %v3863_v36, %v3862_v32  ;;  %v3687_v29 = vadd.f32 %v4999_v25, %v4994_v22 }
 0x362   : > { %v3801_v28 = vpop.f32.mrf.mxu1  ;;  %v3865_v50 = vpop.f32.mrf.mxu0  ;;  %v3751_v22 = vadd.f32 %v5001_v26, %v4996_v23 }
 0x363   : > { %v2750_v51 = vmax.f32 %v2702_v37, 0.0  ;;  %v2610_v10 = vadd.f32 %v3800_v39, %v4981_v57 }
 0x364   : > { %v3802_v53 = vpop.f32.mrf.mxu1  ;;  %v3866_v11 = vpop.f32.mrf.mxu0 }
 0x365   : > { %v2763_v33 = vpack.c.bf16 %v2750_v51, %v2749_v55  ;;  %v3803_v34 = vadd.f32 %v3802_v53, %v3801_v28  ;;  %v2707_v43 = vadd.f32 %v3864_v13, %v2610_v10  ;;  %v3867_v14 = vadd.f32 %v3866_v11, %v3865_v50 }
 0x366   : > { %v3804_v40 = vpop.f32.mrf.mxu1  ;;  %v3868_v4 = vpop.f32.mrf.mxu0  ;;  %v3693_v10 = vadd.f32 %v5010_v47, %v5005_v12  ;;  %v3757_v47 = vadd.f32 %v5012_v48, %v5007_v42 }
 0x367   : > { %v2613_v58 = vadd.f32 %v3803_v34, %v2516_v30  ;;  %2930 = vmatmul.mubr.bf16.gmra.mxu1 %v2763_v33  ;;  %v2751_v16 = vmax.f32 %v2707_v43, 0.0 }
 0x368   : > { %v3805_v56 = vpop.f32.mrf.mxu1  ;;  %v3869_v46 = vpop.f32.mrf.mxu0  ;;  %2939 = vmatprep.mubr.bf16.mxu1 %v4388_v0  ;;  %v2443_v23 = vadd.f32 %v3693_v10, %v4937_v2 }
 0x369   : > { %v2710_v57 = vadd.f32 %v3867_v14, %v2613_v58  ;;  %v3806_v15 = vadd.f32 %v3805_v56, %v3804_v40  ;;  %v3870_v9 = vadd.f32 %v3869_v46, %v3868_v4 }
 0x36a   : > { %v3807_v7 = vpop.f32.mrf.mxu1  ;;  %v3871_v17 = vpop.f32.mrf.mxu0  ;;  %v2540_v8 = vadd.f32 %v3757_v47, %v2443_v23 }
 0x36b   : > { %v2752_v20 = vmax.f32 %v2710_v57, 0.0  ;;  %v2618_v21 = vadd.f32 %v3806_v15, %v4992_v63  ;;  %v2435_v63 = vadd.f32 %v3687_v29, %v4937_v2 }
 0x36c   : > { %v3808_v31 = vpop.f32.mrf.mxu1  ;;  %v3872_v38 = vpop.f32.mrf.mxu0 }
 0x36d   : > { %v2764_v32 = vpack.c.bf16 %v2752_v20, %v2751_v16  ;;  %v3809_v24 = vadd.f32 %v3808_v31, %v3807_v7  ;;  %v2715_v36 = vadd.f32 %v3870_v9, %v2618_v21  ;;  %v3873_v61 = vadd.f32 %v3872_v38, %v3871_v17 }
 0x36e   : > { %v3810_v41 = vpop.f32.mrf.mxu1  ;;  %v3874_v44 = vpop.f32.mrf.mxu0  ;;  %v2532_v11 = vadd.f32 %v3751_v22, %v2435_v63  ;;  %v3699_v16 = vadd.f32 %v5021_v18, %v5016_v59  ;;  %v3763_v59 = vadd.f32 %v5023_v1, %v5018_v60 }
 0x36f   : > { %v2621_v45 = vadd.f32 %v3809_v24, %v2524_v35  ;;  %2940 = vmatmul.mubr.bf16.gmra.mxu1 %v2764_v32  ;;  %v2753_v25 = vmax.f32 %v2715_v36, 0.0 }
 0x370   : > { %v3811_v62 = vpop.f32.mrf.mxu1  ;;  %v3875_v37 = vpop.f32.mrf.mxu0  ;;  %2949 = vmatprep.mubr.bf16.mxu1 %v4388_v0 }
 0x371   : > { %v2718_v39 = vadd.f32 %v3873_v61, %v2621_v45  ;;  %v3812_v28 = vadd.f32 %v3811_v62, %v3810_v41  ;;  %v3876_v33 = vadd.f32 %v3875_v37, %v3874_v44 }
 0x372   : > { %v3813_v50 = vpop.f32.mrf.mxu1  ;;  %v3877_v52 = vpop.f32.mrf.mxu0 }
 0x373   : > { %v2754_v55 = vmax.f32 %v2718_v39, 0.0  ;;  %v2626_v51 = vadd.f32 %v3812_v28, %v5003_v27 }
 0x374   : > { %v3814_v19 = vpop.f32.mrf.mxu1  ;;  %v3878_v53 = vpop.f32.mrf.mxu0 }
 0x375   : > { %v2765_v30 = vpack.c.bf16 %v2754_v55, %v2753_v25  ;;  %v3815_v13 = vadd.f32 %v3814_v19, %v3813_v50  ;;  %v2723_v4 = vadd.f32 %v3876_v33, %v2626_v51  ;;  %v3879_v58 = vadd.f32 %v3878_v53, %v3877_v52 }
 0x376   : > { %v3816_v34 = vpop.f32.mrf.mxu1  ;;  %v3880_v40 = vpop.f32.mrf.mxu0  ;;  %v5086_v51 = vstv %s3561_s17  ;;  %v3025_v19 = vadd.s32 8, %v4765_v3  ;;  %v5354_v53 = vsub.s32 1, %v4765_v3 }
 0x377   : > { %v2629_v43 = vadd.f32 %v3815_v13, %v2532_v11  ;;  %2950 = vmatmul.mubr.bf16.gmra.mxu1 %v2765_v30  ;;  %v2755_v46 = vmax.f32 %v2723_v4, 0.0 }
 0x378   : > { %v3817_v26 = vpop.f32.mrf.mxu1  ;;  %v3881_v14 = vpop.f32.mrf.mxu0  ;;  %2959 = vmatprep.mubr.bf16.mxu1 %v4388_v0 }
 0x379   : > { %v2726_v27 = vadd.f32 %v3879_v58, %v2629_v43  ;;  %v3818_v12 = vadd.f32 %v3817_v26, %v3816_v34  ;;  %v3882_v21 = vadd.f32 %v3881_v14, %v3880_v40  ;;  %v3042_v34 = vadd.s32 %v5086_v51, %v3025_v19  ;;  %v4106_v40 = vld [vmem:[%s4614_s29] sm:$0xff]  ;;  %v4107_v26 = vld [vmem:[%s4614_s29 + $0x8] sm:$0xff] }
 0x37a   : > { %v3819_v54 = vpop.f32.mrf.mxu1  ;;  %v3883_v56 = vpop.f32.mrf.mxu0 }
 0x37b   : > { %v2756_v57 = vmax.f32 %v2726_v27, 0.0  ;;  %v2634_v15 = vadd.f32 %v3818_v12, %v5014_v49  ;;  %v2451_v49 = vadd.f32 %v3699_v16, %v4937_v2  ;;  %vm3058_vm1 = vcmp.lt.s32.totalorder %v3042_v34, 256 }
 0x37c   : > { %v3820_v7 = vpop.f32.mrf.mxu1  ;;  %v3884_v17 = vpop.f32.mrf.mxu0  ;;  %v3030_v34 = vadd.s32 48, %v4765_v3 }
 0x37d   : > { %v2766_v20 = vpack.c.bf16 %v2756_v57, %v2755_v46  ;;  %v3821_v35 = vadd.f32 %v3820_v7, %v3819_v54  ;;  %v2731_v29 = vadd.f32 %v3882_v21, %v2634_v15  ;;  %v3885_v42 = vadd.f32 %v3884_v17, %v3883_v56  ;;  %v4108_v46 = vld [vmem:[%s4614_s29 + $0x10] sm:$0xff] }
 0x37e   : > { %v3822_v31 = vpop.f32.mrf.mxu1  ;;  %v3886_v38 = vpop.f32.mrf.mxu0  ;;  %v2548_v63 = vadd.f32 %v3763_v59, %v2451_v49  ;;  %v3027_v54 = vadd.s32 24, %v4765_v3 }
 0x37f   : > { %v2637_v32 = vadd.f32 %v3821_v35, %v2540_v8  ;;  %2960 = vmatmul.mubr.bf16.gmra.mxu1 %v2766_v20  ;;  %v2757_v18 = vmax.f32 %v2731_v29, 0.0  ;;  %v4109_v20 = vld [vmem:[%s4614_s29 + $0x18] sm:$0xff] }
 0x380   : > { %v3823_v48 = vpop.f32.mrf.mxu1  ;;  %v3887_v9 = vpop.f32.mrf.mxu0  ;;  %2969 = vmatprep.mubr.bf16.mxu1 %v4388_v0 }
 0x381   : > { %v2734_v24 = vadd.f32 %v3885_v42, %v2637_v32  ;;  %v3824_v41 = vadd.f32 %v3823_v48, %v3822_v31  ;;  %v3888_v28 = vadd.f32 %v3887_v9, %v3886_v38  ;;  %v3028_v31 = vadd.s32 32, %v4765_v3  ;;  %v4110_v9 = vld [vmem:[%s4614_s29 + $0x20] sm:$0xff] }
 0x382   : > { %v3825_v44 = vpop.f32.mrf.mxu1  ;;  %v3889_v36 = vpop.f32.mrf.mxu0  ;;  %v3044_v42 = vadd.s32 %v5086_v51, %v3027_v54  ;;  %v3031_v54 = vadd.s32 56, %v4765_v3 }
 0x383   : > { %v2758_v45 = vmax.f32 %v2734_v24, 0.0  ;;  %v2642_v61 = vadd.f32 %v3824_v41, %v5027_v5  ;;  %v2785_v5 = vld [vmem:[%s5321_s8] sm:$0x3] }
 0x384   : > { %v3826_v62 = vpop.f32.mrf.mxu1  ;;  %v3890_v37 = vpop.f32.mrf.mxu0  ;;  %v5090_v10 = vrot.slane %v2785_v5, %v836_v6  ;;  %v5097_v11 = vrot.slane %v2785_v5, %v5354_v53  ;;  %v3026_v6 = vadd.s32 16, %v4765_v3  ;;  %vm3060_vm3 = vcmp.lt.s32.totalorder %v3044_v42, 256  ;;  %v4113_v5 = vld [vmem:[%s4614_s29 + $0x38] sm:$0xff] }
 0x385   : > { %v2767_v39 = vpack.c.bf16 %v2758_v45, %v2757_v18  ;;  %v3827_v50 = vadd.f32 %v3826_v62, %v3825_v44  ;;  %v2739_v52 = vadd.f32 %v3888_v28, %v2642_v61  ;;  %v3891_v22 = vadd.f32 %v3890_v37, %v3889_v36  ;;  %v4111_v18 = vld [vmem:[%s4614_s29 + $0x28] sm:$0xff] }
 0x386   : > { %v3043_v47 = vadd.s32 %v5086_v51, %v3026_v6  ;;  %v3045_v62 = vadd.s32 %v5086_v51, %v3028_v31  ;;  %v3029_v28 = vadd.s32 40, %v4765_v3  ;;  %v3048_v42 = vadd.s32 %v5086_v51, %v3031_v54 }
 0x387   : > { %v2645_v2 = vadd.f32 %v3827_v50, %v2548_v63  ;;  %2970 = vmatmul.mubr.bf16.gmra.mxu1 %v2767_v39  ;;  %v2759_v55 = vmax.f32 %v2739_v52, 0.0  ;;  %v4112_v52 = vld [vmem:[%s4614_s29 + $0x30] sm:$0xff] }
 0x388   : > { %2979 = vmatprep.mubr.bf16.mxu1 %v4388_v0  ;;  %v3041_v0 = vadd.s32 %v5086_v51, %v4765_v3  ;;  %vm3059_vm2 = vcmp.lt.s32.totalorder %v3043_v47, 256  ;;  %vm3061_vm4 = vcmp.lt.s32.totalorder %v3045_v62, 256  ;;  %vm3064_vm7 = vcmp.lt.s32.totalorder %v3048_v42, 256 }
 0x389   : > { %v2742_v25 = vadd.f32 %v3891_v22, %v2645_v2 }
 0x38a   : > { %vm3057_vm0 = vcmp.lt.s32.totalorder %v3041_v0, 256 }
 0x38b   : > { %v2760_v60 = vmax.f32 %v2742_v25, 0.0 }
 0x38d   : > { %v2768_v1 = vpack.c.bf16 %v2760_v60, %v2759_v55 }
 0x38f   : > { %2980 = vmatmul.mubr.bf16.gmra.mxu1 %v2768_v1 }
 0x417   : > { %v2911_v30 = vpop.f32.mrf.mxu1 }
 0x418   : > { %v2912_v33 = vadd.f32 %v2911_v30, %v5090_v10 }
 0x419   : > { %v2913_v13 = vpop.f32.mrf.mxu1 }
 0x41a   : > { %2990 = vst [vmem:[%s5104_s25] sm:$0xff] %v2912_v33  ;;  %v3073_v4 = vsub.f32 %v2912_v33, %v4106_v40  ;;  %v2914_v43 = vadd.f32 %v2913_v13, %v5097_v11  ;;  %v3046_v13 = vadd.s32 %v5086_v51, %v3029_v28  ;;  %v4114_v40 = vld [vmem:[%s4614_s29 + $0x40] sm:$0xff] }
 0x41b   : > { %v2915_v58 = vpop.f32.mrf.mxu1 }
 0x41c   : > { %v3105_v23 = vsel %vm3057_vm0, %v3073_v4, 0.0  ;;  %2991 = vst [vmem:[%s5104_s25 + $0x8] sm:$0xff] %v2914_v43  ;;  %v3074_v14 = vsub.f32 %v2914_v43, %v4107_v26  ;;  %v2916_v27 = vadd.f32 %v2915_v58, %v5090_v10  ;;  %vm3062_vm5 = vcmp.lt.s32.totalorder %v3046_v13, 256 }
 0x41d   : > { %v2917_v12 = vpop.f32.mrf.mxu1  ;;  %v3137_v8 = vmul.f32 %v3105_v23, %v3105_v23 }
 0x41e   : > { %v3106_v56 = vsel %vm3057_vm0, %v3074_v14, 0.0  ;;  %2992 = vst [vmem:[%s5104_s25 + $0x10] sm:$0xff] %v2916_v27  ;;  %v3075_v57 = vsub.f32 %v2916_v27, %v4108_v46  ;;  %v2918_v15 = vadd.f32 %v2917_v12, %v5097_v11  ;;  %v4115_v27 = vld [vmem:[%s4614_s29 + $0x48] sm:$0xff] }
 0x41f   : > { %v3138_v7 = vmul.f32 %v3106_v56, %v3106_v56  ;;  %v2921_v17 = vpop.f32.mrf.mxu1 }
 0x420   : > { %v3107_v16 = vsel %vm3058_vm1, %v3075_v57, 0.0  ;;  %2993 = vst [vmem:[%s5104_s25 + $0x18] sm:$0xff] %v2918_v15  ;;  %v3076_v21 = vsub.f32 %v2918_v15, %v4109_v20  ;;  %v2922_v35 = vadd.f32 %v2921_v17, %v5090_v10  ;;  %v3047_v15 = vadd.s32 %v5086_v51, %v3030_v34 }
 0x421   : > { %v3169_v38 = vadd.f32 %v3138_v7, %v3137_v8  ;;  %v3139_v29 = vmul.f32 %v3107_v16, %v3107_v16  ;;  %v2923_v32 = vpop.f32.mrf.mxu1  ;;  %v4116_v7 = vld [vmem:[%s4614_s29 + $0x50] sm:$0xff]  ;;  %v3034_v34 = vadd.s32 80, %v4765_v3 }
 0x422   : > { %v3108_v48 = vsel %vm3058_vm1, %v3076_v21, 0.0  ;;  %2994 = vst [vmem:[%s5104_s25 + $0x20] sm:$0xff] %v2922_v35  ;;  %v3077_v49 = vsub.f32 %v2922_v35, %v4110_v9  ;;  %v2924_v24 = vadd.f32 %v2923_v32, %v5097_v11  ;;  %vm3063_vm6 = vcmp.lt.s32.totalorder %v3047_v15, 256 }
 0x423   : > { %v3170_v41 = vadd.f32 %v3169_v38, %v3139_v29  ;;  %v3140_v44 = vmul.f32 %v3108_v48, %v3108_v48  ;;  %v2925_v36 = vpop.f32.mrf.mxu1  ;;  %v4117_v38 = vld [vmem:[%s4614_s29 + $0x58] sm:$0xff]  ;;  %v3051_v15 = vadd.s32 %v5086_v51, %v3034_v34 }
 0x424   : > { %v3109_v59 = vsel %vm3059_vm2, %v3077_v49, 0.0  ;;  %2995 = vst [vmem:[%s5104_s25 + $0x28] sm:$0xff] %v2924_v24  ;;  %v3078_v45 = vsub.f32 %v2924_v24, %v4111_v18  ;;  %v2926_v61 = vadd.f32 %v2925_v36, %v5090_v10  ;;  %v3032_v24 = vadd.s32 64, %v4765_v3 }
 0x425   : > { %v3171_v37 = vadd.f32 %v3170_v41, %v3140_v44  ;;  %v3141_v63 = vmul.f32 %v3109_v59, %v3109_v59  ;;  %v2927_v39 = vpop.f32.mrf.mxu1  ;;  %v4118_v44 = vld [vmem:[%s4614_s29 + $0x60] sm:$0xff]  ;;  %vm3067_vm10 = vcmp.lt.s32.totalorder %v3051_v15, 256 }
 0x426   : > { %v3110_v50 = vsel %vm3059_vm2, %v3078_v45, 0.0  ;;  %2996 = vst [vmem:[%s5104_s25 + $0x30] sm:$0xff] %v2926_v61  ;;  %v3079_v2 = vsub.f32 %v2926_v61, %v4112_v52  ;;  %v2928_v22 = vadd.f32 %v2927_v39, %v5097_v11 }
 0x427   : > { %v3172_v25 = vadd.f32 %v3171_v37, %v3141_v63  ;;  %v3142_v55 = vmul.f32 %v3110_v50, %v3110_v50  ;;  %v2931_v60 = vpop.f32.mrf.mxu1  ;;  %v4119_v37 = vld [vmem:[%s4614_s29 + $0x68] sm:$0xff] }
 0x428   : > { %v3111_v1 = vsel %vm3060_vm3, %v3079_v2, 0.0  ;;  %2997 = vst [vmem:[%s5104_s25 + $0x38] sm:$0xff] %v2928_v22  ;;  %v3080_v0 = vsub.f32 %v2928_v22, %v4113_v5  ;;  %v2932_v19 = vadd.f32 %v2931_v60, %v5090_v10  ;;  %v3049_v2 = vadd.s32 %v5086_v51, %v3032_v24 }
 0x429   : > { %v3173_v53 = vadd.f32 %v3172_v25, %v3142_v55  ;;  %v3143_v30 = vmul.f32 %v3111_v1, %v3111_v1  ;;  %v2933_v33 = vpop.f32.mrf.mxu1  ;;  %v3033_v22 = vadd.s32 72, %v4765_v3  ;;  %v4120_v55 = vld [vmem:[%s4614_s29 + $0x70] sm:$0xff] }
 0x42a   : > { %v3112_v6 = vsel %vm3060_vm3, %v3080_v0, 0.0  ;;  %2998 = vst [vmem:[%s5104_s25 + $0x40] sm:$0xff] %v2932_v19  ;;  %v3081_v4 = vsub.f32 %v2932_v19, %v4114_v40  ;;  %v2934_v43 = vadd.f32 %v2933_v33, %v5097_v11  ;;  %vm3065_vm8 = vcmp.lt.s32.totalorder %v3049_v2, 256 }
 0x42b   : > { %v3174_v58 = vadd.f32 %v3173_v53, %v3143_v30  ;;  %v3144_v23 = vmul.f32 %v3112_v6, %v3112_v6  ;;  %v2935_v26 = vpop.f32.mrf.mxu1  ;;  %v4121_v30 = vld [vmem:[%s4614_s29 + $0x78] sm:$0xff] }
 0x42c   : > { %v3113_v14 = vsel %vm3061_vm4, %v3081_v4, 0.0  ;;  %2999 = vst [vmem:[%s5104_s25 + $0x48] sm:$0xff] %v2934_v43  ;;  %v3082_v12 = vsub.f32 %v2934_v43, %v4115_v27  ;;  %v2936_v47 = vadd.f32 %v2935_v26, %v5090_v10  ;;  %v3050_v43 = vadd.s32 %v5086_v51, %v3033_v22 }
 0x42d   : > { %v3175_v56 = vadd.f32 %v3174_v58, %v3144_v23  ;;  %v3145_v46 = vmul.f32 %v3113_v14, %v3113_v14  ;;  %v2937_v57 = vpop.f32.mrf.mxu1  ;;  %v4122_v23 = vld [vmem:[%s4614_s29 + $0x80] sm:$0xff]  ;;  %v3037_v22 = vadd.s32 104, %v4765_v3 }
 0x42e   : > { %v3114_v8 = vsel %vm3061_vm4, %v3082_v12, 0.0  ;;  %3000 = vst [vmem:[%s5104_s25 + $0x50] sm:$0xff] %v2936_v47  ;;  %v3083_v17 = vsub.f32 %v2936_v47, %v4116_v7  ;;  %v2938_v16 = vadd.f32 %v2937_v57, %v5097_v11  ;;  %vm3066_vm9 = vcmp.lt.s32.totalorder %v3050_v43, 256 }
 0x42f   : > { %v3176_v20 = vadd.f32 %v3175_v56, %v3145_v46  ;;  %v3146_v21 = vmul.f32 %v3114_v8, %v3114_v8  ;;  %v2941_v35 = vpop.f32.mrf.mxu1  ;;  %v4123_v56 = vld [vmem:[%s4614_s29 + $0x88] sm:$0xff]  ;;  %v3054_v43 = vadd.s32 %v5086_v51, %v3037_v22 }
 0x430   : > { %v3115_v31 = vsel %vm3062_vm5, %v3083_v17, 0.0  ;;  %3001 = vst [vmem:[%s5104_s25 + $0x58] sm:$0xff] %v2938_v16  ;;  %v3084_v29 = vsub.f32 %v2938_v16, %v4117_v38  ;;  %v2942_v32 = vadd.f32 %v2941_v35, %v5090_v10  ;;  %v3035_v16 = vadd.s32 88, %v4765_v3 }
 0x431   : > { %v3177_v48 = vadd.f32 %v3176_v20, %v3146_v21  ;;  %v3147_v9 = vmul.f32 %v3115_v31, %v3115_v31  ;;  %v2943_v49 = vpop.f32.mrf.mxu1  ;;  %v4124_v21 = vld [vmem:[%s4614_s29 + $0x90] sm:$0xff]  ;;  %vm3070_vm13 = vcmp.lt.s32.totalorder %v3054_v43, 256 }
 0x432   : > { %v3116_v41 = vsel %vm3062_vm5, %v3084_v29, 0.0  ;;  %3002 = vst [vmem:[%s5104_s25 + $0x60] sm:$0xff] %v2942_v32  ;;  %v3085_v36 = vsub.f32 %v2942_v32, %v4118_v44  ;;  %v2944_v59 = vadd.f32 %v2943_v49, %v5097_v11 }
 0x433   : > { %v3178_v18 = vadd.f32 %v3177_v48, %v3147_v9  ;;  %v3148_v45 = vmul.f32 %v3116_v41, %v3116_v41  ;;  %v2945_v61 = vpop.f32.mrf.mxu1  ;;  %v4125_v48 = vld [vmem:[%s4614_s29 + $0x98] sm:$0xff] }
 0x434   : > { %v3117_v62 = vsel %vm3063_vm6, %v3085_v36, 0.0  ;;  %3003 = vst [vmem:[%s5104_s25 + $0x68] sm:$0xff] %v2944_v59  ;;  %v3086_v63 = vsub.f32 %v2944_v59, %v4119_v37  ;;  %v2946_v39 = vadd.f32 %v2945_v61, %v5090_v10  ;;  %v3052_v36 = vadd.s32 %v5086_v51, %v3035_v16 }
 0x435   : > { %v3179_v28 = vadd.f32 %v3178_v18, %v3148_v45  ;;  %v3149_v50 = vmul.f32 %v3117_v62, %v3117_v62  ;;  %v2947_v52 = vpop.f32.mrf.mxu1  ;;  %v3036_v59 = vadd.s32 96, %v4765_v3  ;;  %v4126_v45 = vld [vmem:[%s4614_s29 + $0xa0] sm:$0xff] }
 0x436   : > { %v3118_v25 = vsel %vm3063_vm6, %v3086_v63, 0.0  ;;  %3004 = vst [vmem:[%s5104_s25 + $0x70] sm:$0xff] %v2946_v39  ;;  %v3087_v60 = vsub.f32 %v2946_v39, %v4120_v55  ;;  %v2948_v1 = vadd.f32 %v2947_v52, %v5097_v11  ;;  %vm3068_vm11 = vcmp.lt.s32.totalorder %v3052_v36, 256 }
 0x437   : > { %v3180_v5 = vadd.f32 %v3179_v28, %v3149_v50  ;;  %v3150_v0 = vmul.f32 %v3118_v25, %v3118_v25  ;;  %v2951_v19 = vpop.f32.mrf.mxu1  ;;  %v4127_v50 = vld [vmem:[%s4614_s29 + $0xa8] sm:$0xff] }
 0x438   : > { %v3119_v53 = vsel %vm3064_vm7, %v3087_v60, 0.0  ;;  %3005 = vst [vmem:[%s5104_s25 + $0x78] sm:$0xff] %v2948_v1  ;;  %v3088_v33 = vsub.f32 %v2948_v1, %v4121_v30  ;;  %v2952_v13 = vadd.f32 %v2951_v19, %v5090_v10  ;;  %v3053_v1 = vadd.s32 %v5086_v51, %v3036_v59 }
 0x439   : > { %v3181_v6 = vadd.f32 %v3180_v5, %v3150_v0  ;;  %v3151_v40 = vmul.f32 %v3119_v53, %v3119_v53  ;;  %v2953_v4 = vpop.f32.mrf.mxu1  ;;  %v4128_v0 = vld [vmem:[%s4614_s29 + $0xb0] sm:$0xff] }
 0x43a   : > { %v3120_v58 = vsel %vm3064_vm7, %v3088_v33, 0.0  ;;  %3006 = vst [vmem:[%s5104_s25 + $0x80] sm:$0xff] %v2952_v13  ;;  %v3089_v26 = vsub.f32 %v2952_v13, %v4122_v23  ;;  %v2954_v14 = vadd.f32 %v2953_v4, %v5097_v11  ;;  %vm3069_vm12 = vcmp.lt.s32.totalorder %v3053_v1, 256 }
 0x43b   : > { %v3182_v27 = vadd.f32 %v3181_v6, %v3151_v40  ;;  %v3152_v12 = vmul.f32 %v3120_v58, %v3120_v58  ;;  %v2955_v47 = vpop.f32.mrf.mxu1  ;;  %v4129_v6 = vld [vmem:[%s4614_s29 + $0xb8] sm:$0xff] }
 0x43c   : > { %v3121_v54 = vsel %vm3065_vm8, %v3089_v26, 0.0  ;;  %3007 = vst [vmem:[%s5104_s25 + $0x88] sm:$0xff] %v2954_v14  ;;  %v3090_v46 = vsub.f32 %v2954_v14, %v4123_v56  ;;  %v2956_v57 = vadd.f32 %v2955_v47, %v5090_v10  ;;  %v3038_v14 = vadd.s32 112, %v4765_v3 }
 0x43d   : > { %v3183_v8 = vadd.f32 %v3182_v27, %v3152_v12  ;;  %v3153_v7 = vmul.f32 %v3121_v54, %v3121_v54  ;;  %v2957_v17 = vpop.f32.mrf.mxu1  ;;  %v4130_v12 = vld [vmem:[%s4614_s29 + $0xc0] sm:$0xff] }
 0x43e   : > { %v3122_v20 = vsel %vm3065_vm8, %v3090_v46, 0.0  ;;  %3008 = vst [vmem:[%s5104_s25 + $0x90] sm:$0xff] %v2956_v57  ;;  %v3091_v35 = vsub.f32 %v2956_v57, %v4124_v21  ;;  %v2958_v31 = vadd.f32 %v2957_v17, %v5097_v11 }
 0x43f   : > { %v3184_v38 = vadd.f32 %v3183_v8, %v3153_v7  ;;  %v3154_v29 = vmul.f32 %v3122_v20, %v3122_v20  ;;  %v2961_v32 = vpop.f32.mrf.mxu1  ;;  %v4131_v8 = vld [vmem:[%s4614_s29 + $0xc8] sm:$0xff] }
 0x440   : > { %v3123_v42 = vsel %vm3066_vm9, %v3091_v35, 0.0  ;;  %3009 = vst [vmem:[%s5104_s25 + $0x98] sm:$0xff] %v2958_v31  ;;  %v3092_v9 = vsub.f32 %v2958_v31, %v4125_v48  ;;  %v2962_v49 = vadd.f32 %v2961_v32, %v5090_v10  ;;  %v3055_v35 = vadd.s32 %v5086_v51, %v3038_v14 }
 0x441   : > { %v3185_v24 = vadd.f32 %v3184_v38, %v3154_v29  ;;  %v3155_v41 = vmul.f32 %v3123_v42, %v3123_v42  ;;  %v2963_v44 = vpop.f32.mrf.mxu1  ;;  %v3039_v31 = vadd.s32 120, %v4765_v3  ;;  %v4132_v29 = vld [vmem:[%s4614_s29 + $0xd0] sm:$0xff] }
 0x442   : > { %v3124_v18 = vsel %vm3066_vm9, %v3092_v9, 0.0  ;;  %3010 = vst [vmem:[%s5104_s25 + $0xa0] sm:$0xff] %v2962_v49  ;;  %v3093_v61 = vsub.f32 %v2962_v49, %v4126_v45  ;;  %v2964_v62 = vadd.f32 %v2963_v44, %v5097_v11  ;;  %vm3071_vm14 = vcmp.lt.s32.totalorder %v3055_v35, 256 }
 0x443   : > { %v3186_v37 = vadd.f32 %v3185_v24, %v3155_v41  ;;  %v3156_v63 = vmul.f32 %v3124_v18, %v3124_v18  ;;  %v2965_v39 = vpop.f32.mrf.mxu1  ;;  %v4133_v41 = vld [vmem:[%s4614_s29 + $0xd8] sm:$0xff]  ;;  %v3056_v45 = vadd.s32 %v5086_v51, %v3039_v31 }
 0x444   : > { %v3125_v28 = vsel %vm3067_vm10, %v3093_v61, 0.0  ;;  %3011 = vst [vmem:[%s5104_s25 + $0xa8] sm:$0xff] %v2964_v62  ;;  %v3094_v52 = vsub.f32 %v2964_v62, %v4127_v50  ;;  %v2966_v2 = vadd.f32 %v2965_v39, %v5090_v10  ;;  %v4134_v62 = vld [vmem:[%s4614_s29 + $0xe0] sm:$0xff] }
 0x445   : > { %v3187_v25 = vadd.f32 %v3186_v37, %v3156_v63  ;;  %v3157_v55 = vmul.f32 %v3125_v28, %v3125_v28  ;;  %v2967_v60 = vpop.f32.mrf.mxu1  ;;  %vm3072_vm15 = vcmp.lt.s32.totalorder %v3056_v45, 256 }
 0x446   : > { %v3126_v5 = vsel %vm3067_vm10, %v3094_v52, 0.0  ;;  %3012 = vst [vmem:[%s5104_s25 + $0xb0] sm:$0xff] %v2966_v2  ;;  %v3095_v19 = vsub.f32 %v2966_v2, %v4128_v0  ;;  %v2968_v53 = vadd.f32 %v2967_v60, %v5097_v11  ;;  %v4135_v2 = vld [vmem:[%s4614_s29 + $0xe8] sm:$0xff] }
 0x447   : > { %v3188_v30 = vadd.f32 %v3187_v25, %v3157_v55  ;;  %v3158_v33 = vmul.f32 %v3126_v5, %v3126_v5  ;;  %v2971_v13 = vpop.f32.mrf.mxu1  ;;  %v4136_v5 = vld [vmem:[%s4614_s29 + $0xf0] sm:$0xff] }
 0x448   : > { %v3127_v34 = vsel %vm3068_vm11, %v3095_v19, 0.0  ;;  %3013 = vst [vmem:[%s5104_s25 + $0xb8] sm:$0xff] %v2968_v53  ;;  %v3096_v40 = vsub.f32 %v2968_v53, %v4129_v6  ;;  %v2972_v4 = vadd.f32 %v2971_v13, %v5090_v10 }
 0x449   : > { %v3189_v58 = vadd.f32 %v3188_v30, %v3158_v33  ;;  %v3159_v23 = vmul.f32 %v3127_v34, %v3127_v34  ;;  %v2973_v26 = vpop.f32.mrf.mxu1  ;;  %v4137_v33 = vld [vmem:[%s4614_s29 + $0xf8] sm:$0xff]  ;;  %s3212_s29 = scalar_lea.sflag [#allocation4], %s4608_s4 }
 0x44a   : > { %v3128_v27 = vsel %vm3068_vm11, %v3096_v40, 0.0  ;;  %3014 = vst [vmem:[%s5104_s25 + $0xc0] sm:$0xff] %v2972_v4  ;;  %v3097_v47 = vsub.f32 %v2972_v4, %v4130_v12  ;;  %v2974_v54 = vadd.f32 %v2973_v26, %v5097_v11 }
 0x44b   : > { %v3190_v56 = vadd.f32 %v3189_v58, %v3159_v23  ;;  %v3160_v46 = vmul.f32 %v3128_v27, %v3128_v27  ;;  %v2975_v57 = vpop.f32.mrf.mxu1 }
 0x44c   : > { %v3129_v15 = vsel %vm3069_vm12, %v3097_v47, 0.0  ;;  %3015 = vst [vmem:[%s5104_s25 + $0xc8] sm:$0xff] %v2974_v54  ;;  %v3098_v7 = vsub.f32 %v2974_v54, %v4131_v8  ;;  %v2976_v17 = vadd.f32 %v2975_v57, %v5090_v10 }
 0x44d   : > { %v3191_v16 = vadd.f32 %v3190_v56, %v3160_v46  ;;  %v3161_v20 = vmul.f32 %v3129_v15, %v3129_v15  ;;  %v2977_v21 = vpop.f32.mrf.mxu1 }
 0x44e   : > { %v3130_v38 = vsel %vm3069_vm12, %v3098_v7, 0.0  ;;  %3016 = vst [vmem:[%s5104_s25 + $0xd0] sm:$0xff] %v2976_v17  ;;  %v3099_v32 = vsub.f32 %v2976_v17, %v4132_v29  ;;  %v2978_v42 = vadd.f32 %v2977_v21, %v5097_v11 }
 0x44f   : > { %v3192_v48 = vadd.f32 %v3191_v16, %v3161_v20  ;;  %v3162_v9 = vmul.f32 %v3130_v38, %v3130_v38  ;;  %v2981_v49 = vpop.f32.mrf.mxu1 }
 0x450   : > { %v3131_v24 = vsel %vm3070_vm13, %v3099_v32, 0.0  ;;  %3017 = vst [vmem:[%s5104_s25 + $0xd8] sm:$0xff] %v2978_v42  ;;  %v3100_v44 = vsub.f32 %v2978_v42, %v4133_v41  ;;  %v2982_v3 = vadd.f32 %v2981_v49, %v5090_v10 }
 0x451   : > { %v3193_v36 = vadd.f32 %v3192_v48, %v3162_v9  ;;  %v3163_v59 = vmul.f32 %v3131_v24, %v3131_v24  ;;  %v2983_v18 = vpop.f32.mrf.mxu1 }
 0x452   : > { %v3132_v61 = vsel %vm3070_vm13, %v3100_v44, 0.0  ;;  %3018 = vst [vmem:[%s5104_s25 + $0xe0] sm:$0xff] %v2982_v3  ;;  %v3101_v37 = vsub.f32 %v2982_v3, %v4134_v62  ;;  %v2984_v63 = vadd.f32 %v2983_v18, %v5097_v11 }
 0x453   : > { %v3194_v39 = vadd.f32 %v3193_v36, %v3163_v59  ;;  %v3164_v28 = vmul.f32 %v3132_v61, %v3132_v61  ;;  %v2985_v50 = vpop.f32.mrf.mxu1 }
 0x454   : > { %v3133_v52 = vsel %vm3071_vm14, %v3101_v37, 0.0  ;;  %3019 = vst [vmem:[%s5104_s25 + $0xe8] sm:$0xff] %v2984_v63  ;;  %v3102_v22 = vsub.f32 %v2984_v63, %v4135_v2  ;;  %v2986_v51 = vadd.f32 %v2985_v50, %v5090_v10 }
 0x455   : > { %v3195_v25 = vadd.f32 %v3194_v39, %v3164_v28  ;;  %v3165_v55 = vmul.f32 %v3133_v52, %v3133_v52  ;;  %v2987_v60 = vpop.f32.mrf.mxu1 }
 0x456   : > { %v3134_v1 = vsel %vm3071_vm14, %v3102_v22, 0.0  ;;  %3020 = vst [vmem:[%s5104_s25 + $0xf0] sm:$0xff] %v2986_v51  ;;  %v3103_v0 = vsub.f32 %v2986_v51, %v4136_v5  ;;  %v2988_v19 = vadd.f32 %v2987_v60, %v5097_v11 }
 0x457   : > { %v3166_v53 = vmul.f32 %v3134_v1, %v3134_v1  ;;  %v3196_v30 = vadd.f32 %v3195_v25, %v3165_v55 }
 0x458   : > { %3021 = vst [vmem:[%s5104_s25 + $0xf8] sm:$0xff] %v2988_v19  ;;  %v3104_v13 = vsub.f32 %v2988_v19, %v4137_v33  ;;  %v3135_v10 = vsel %vm3072_vm15, %v3103_v0, 0.0 }
 0x459   : > { %v3167_v34 = vmul.f32 %v3135_v10, %v3135_v10  ;;  %v3197_v6 = vadd.f32 %v3196_v30, %v3166_v53 }
 0x45a   : > { %v3136_v40 = vsel %vm3072_vm15, %v3104_v13, 0.0 }
 0x45b   : > { %v3168_v4 = vmul.f32 %v3136_v40, %v3136_v40  ;;  %v3198_v43 = vadd.f32 %v3197_v6, %v3167_v34 }
 0x45d   : > { %v3199_v58 = vadd.f32 %v3198_v43, %v3168_v4 }
 0x45f   : > { %3200 = vadd.xlane.f32.xlu0 %v3199_v58 }
 0x460   : > { %4309 = shalt.err (!%p4306_p3)
}
 0x461   : > { %s4310_s17 = scalar_lea.hbm %s5263_s27, 4096  ;;  %s4314_s25 = scalar_lea.hbm %s5322_s9, 8192 }
 0x462   : > { %p4311_p4 = scmp.ne.s32.totalorder %s5263_s27, %s4310_s17  ;;  %p4315_p2 = scmp.lt.s32.totalorder %s5263_s27, %s5322_s9 }
 0x463   : > { %p4316_p7 = scmp.lt.s32.totalorder %s4314_s25, %s4310_s17 }
 0x464   : > { %p4312_p12 = pnand %p4311_p4, %p5355_p11 }
 0x465   : > { %p4317_p9 = por %p4316_p7, %p4315_p2 }
 0x466   : > { %p4313_p6 = pneg %p4312_p12 }
 0x468   : > { %p4318_p10 = pnand %p4317_p9, %p4313_p6 }
 0x46a   : > { %4321 = shalt.err (!%p4318_p10)
}
 0x46b   : > { %s4390_s5 = smov 256   ;;  %s4391_s1 = smov 16  }
 0x46c   : > { %3916 = dma.vmem_to_hbm [thread:$0]  (%p5355_p11), %s5265_s3, 4096, %s5263_s27, %s3212_s29, %s4390_s5, %s4390_s5, %s4391_s1  }
 0x46d   : > { %p459_p0 = scmp.lt.s32.totalorder %s4468_s19, 1 }
 0x46f   : > { %s5363_s19 = smov (!%p459_p0, %s4468_s19), 1 }
 0x470   : > { %s3398_s20 = sshll.u32 %s5363_s19, 3 }
 0x471   : > { %s462_s17 = scalar_lea.vmem %s5323_s10, %s3398_s20 }
 0x4e8   : > { %v3201_v11 = vpop.xlane.xlu0 %3200 }
 0x4e9   : > { %v3202_v23 = vrot.slane %v3201_v11, 4 }
 0x4eb   : > { %v3203_v26 = vadd.f32 %v3202_v23, %v3201_v11 }
 0x4ed   : > { %v3204_v14 = vrot.slane %v3203_v26, 2 }
 0x4ef   : > { %v3205_v27 = vadd.f32 %v3204_v14, %v3203_v26 }
 0x4f1   : > { %v3206_v12 = vrot.slane %v3205_v27, 1 }
 0x4f3   : > { %v3207_v47 = vadd.f32 %v3206_v12, %v3205_v27 }
 0x4f5   : > { %3892 = vpush %v3207_v47 }
 0x526   : > { %s3893_s11 = spop %3892 }
 0x527   : > { %v3209_v54 = vstv %s3893_s11 }
 0x528   : > { %3210 = vst [vmem:[%s462_s17] sm:$0xff] %v3209_v54 }
 0x529 PF: > { %s3248_s21 = sand.u32 1, %s4360_s13   ;;  %p5356_p11 = scmp.ne.s32.totalorder %s5344_s24, 0 }
 0x52a   : > { %p5357_p13 = scmp.ge.s32.totalorder %s4372_s16, 2  ;;  %s3249_s4 = scalar_lea.sflag [#allocation4], %s3248_s21 }
 0x52c   : > { %p3939_p5 = pnand %p5357_p13, %p5356_p11 }
 0x52e   : > { %p3940_p8 = pneg %p3939_p5 }
 0x530   : > { %4355 = dma.done.wait (%p3940_p8), %s3249_s4, 4096  }
 0x531   : > { %4357 = vsyncadd (%p3940_p8), %s3249_s4, 4294963200  ;;  %p27_p1 = scmp.ge.s32.totalorder %s4542_s22, 4   ;;  %s5358_s13 = smov %s4364_s14 }
 0x532   : > { %s5359_s14 = smov %s4368_s15  ;;  %s5360_s15 = smov %s4554_s18 }
 0x533   : > { %s5361_s16 = smov %s4542_s22  ;;  %29 = sbr.rel (!%p27_p1) target bundleno = 13 (0xd), region = 133 }
 0x538   :  { %3261 = vsyncpa [#allocation3], 1 }
 0x539   :  { %3263 = vsyncpa [#allocation3 + $0x1], 1 }
 0x53a   :  { %3264 = vsyncpa [#allocation6], 1 }
 0x53b   :  { %3265 = vsyncpa [#allocation9], 1 }
 0x53c   :  { %3266 = vsyncpa [#allocation12], 1 }
 0x53d   :  { %3267 = vsyncpa [#allocation4], 1 }
 0x53e   :  { %3269 = vsyncpa [#allocation4 + $0x1], 1 }

</bundles_post_ra>
